<compile_context>
chip_gen: v7x
topology: tpu7x:2x2x1
jax: 0.10.0
libtpu: 0.0.40
codegen_flags: <defaults>
</compile_context>

<pallas_src>
import functools

import jax
import jax.numpy as jnp
from jax import lax
from jax.experimental import pallas as pl
from jax.experimental.pallas import tpu as pltpu

EPS = 1e-5


def residual_block_kernel(n, h, w, cin, cout,
                          xpad_ref, b1_ref, b2_ref, ga_ref, gb_ref, bn_ref,
                          out_ref, hpad_ref):
    rows = n * h
    wc = w * cout                        # lanes per branch (= 128 in the demo)
    inv_cnt = 1.0 / float(n * h * w)     # elements per BN channel

    def conv3x3_rows(src_ref, rhs_ref, kdim):
        """3x3 conv as 3 accumulating MXU matmuls over kh-shifted row views.

        src_ref: (n, h+2, kdim) y-padded lane-dense activation.
        rhs_ref: (3, kdim, nout) banded weights (kw taps + channel mixing).
        Returns (n*h, nout) f32.
        """
        acc = None
        for kh in range(3):
            lhs = src_ref[:, kh:kh + h, :].reshape(rows, kdim)
            part = jnp.dot(lhs, rhs_ref[kh], preferred_element_type=jnp.float32)
            acc = part if acc is None else acc + part
        return acc

    def bn_train(acc, gather, gamma, beta):
        """Training-mode BN on lane-dense (rows, w*C) data.

        Per-channel batch stats (biased variance): sublane row-sum, then a tiny
        MXU matmul with `gather` (0/1 channel-grouping matrix) sums each channel
        over its w lane positions AND broadcasts the stat back to every lane —
        no lane<->sublane relayout.  Two-pass (shifted) variance.
        """
        mu = jnp.dot(jnp.sum(acc, axis=0, keepdims=True), gather,
                     preferred_element_type=jnp.float32) * inv_cnt
        d = acc - mu
        var = jnp.dot(jnp.sum(d * d, axis=0, keepdims=True), gather,
                      preferred_element_type=jnp.float32) * inv_cnt
        return d * (lax.rsqrt(var + EPS) * gamma) + beta

    # ---- conv1 (3x3) + 1x1 shortcut fused: both branches side by side ----
    accA = conv3x3_rows(xpad_ref, b1_ref, w * cin)           # (rows, 2*wc)

    # ---- fused BN1 + BN_shortcut over the 2*cout fused channels ----
    bnA = bn_train(accA, ga_ref[...],
                   bn_ref[0:1, 0:2 * wc], bn_ref[1:2, 0:2 * wc])
    h1 = jnp.maximum(bnA[:, :wc], 0.0)                       # conv1 branch (ReLU)
    short = bnA[:, wc:]                                      # shortcut branch

    # ---- conv2: y-pad h1 into a lane-dense scratch, 3 accumulating matmuls ----
    zrow = jnp.zeros((n, 1, wc), jnp.float32)
    hpad_ref[:, 0:1, :] = zrow
    hpad_ref[:, h + 1:h + 2, :] = zrow
    hpad_ref[:, 1:h + 1, :] = h1.reshape(n, h, wc)
    acc2 = conv3x3_rows(hpad_ref, b2_ref, wc)                # (rows, wc)

    # ---- BN2, residual add, final ReLU; output already lane-dense ----
    left = bn_train(acc2, gb_ref[...],
                    bn_ref[0:1, 2 * wc:3 * wc], bn_ref[1:2, 2 * wc:3 * wc])
    out_ref[...] = jnp.maximum(left + short, 0.0)


def _banded_rhs(wtaps, w):
    """(3_kw, ci, co) taps -> (w*ci, w*co) block-banded matrix that applies the
    three kw offsets (implicit zero padding in x) and the channel mixing."""
    out = None
    for kw in range(3):
        shift = jnp.eye(w, w, k=1 - kw, dtype=jnp.float32)   # [x+kw-1, x] = 1
        blk = jnp.kron(shift, wtaps[kw].astype(jnp.float32))
        out = blk if out is None else out + blk
    return out


def residual_block_forward(x_nchw, p):
    """x_nchw: (N, Cin, H, W) float32 -> (N, Cout, H, W) float32."""
    n, cin, h, w = x_nchw.shape
    cout = p["w1"].shape[-1]
    wc = w * cout

    # NCHW -> NHWC, pad only the y halo, fold (w, cin) into a lane-dense last
    # dim.  The x halo is absorbed by the banded RHS -> no 9x im2col.
    x_nhwc = jnp.transpose(x_nchw, (0, 2, 3, 1)).astype(jnp.float32)
    xpad = jnp.pad(x_nhwc, ((0, 0), (1, 1), (0, 0), (0, 0))).reshape(n, h + 2, w * cin)

    # Banded RHS for conv1, with the 1x1 shortcut injected at the kh=1 matrix
    # (centre row tap), writing to output lanes [wc, 2*wc).
    b1 = []
    for kh in range(3):
        conv_part = _banded_rhs(p["w1"][kh], w)                         # (w*cin, wc)
        if kh == 1:
            sc_part = jnp.kron(jnp.eye(w, dtype=jnp.float32), p["ws"])  # (w*cin, wc)
        else:
            sc_part = jnp.zeros((w * cin, wc), jnp.float32)
        b1.append(jnp.concatenate([conv_part, sc_part], axis=1))
    b1 = jnp.stack(b1)                                                  # (3, w*cin, 2*wc)
    b2 = jnp.stack([_banded_rhs(p["w2"][kh], w) for kh in range(3)])    # (3, wc, wc)

    # Channel-grouping matrices: rowsum @ G sums each channel over its w lane
    # positions and broadcasts it back to every lane (one tiny MXU matmul).
    g_b = jnp.kron(jnp.ones((w, w), jnp.float32), jnp.eye(cout, dtype=jnp.float32))
    g_a = jnp.kron(jnp.eye(2, dtype=jnp.float32), g_b)

    # All six BN parameter vectors packed into ONE lane-dense (2, 3*wc) array,
    # pre-tiled to the x*cout + c lane layout: rows = [gamma | beta],
    # lane blocks = [conv1 | shortcut | conv2].
    def lane_tile(v):
        return jnp.tile(v.reshape(1, cout).astype(jnp.float32), (1, w))

    gamma = jnp.concatenate(
        [lane_tile(p["g1"]), lane_tile(p["gs"]), lane_tile(p["g2"])], axis=1)
    beta = jnp.concatenate(
        [lane_tile(p["b1"]), lane_tile(p["bs"]), lane_tile(p["b2"])], axis=1)
    bn = jnp.concatenate([gamma, beta], axis=0)                         # (2, 3*wc)

    kernel = functools.partial(residual_block_kernel, n, h, w, cin, cout)
    out2d = pl.pallas_call(
        kernel,
        out_shape=jax.ShapeDtypeStruct((n * h, wc), jnp.float32),
        in_specs=[pl.BlockSpec(memory_space=pltpu.MemorySpace.VMEM)] * 6,
        out_specs=pl.BlockSpec(memory_space=pltpu.MemorySpace.VMEM),
        scratch_shapes=[pltpu.VMEM((n, h + 2, wc), jnp.float32)],
    )(xpad, b1, b2, g_a, g_b, bn)

    out_nhwc = out2d.reshape(n, h, w, cout)
    return jnp.transpose(out_nhwc, (0, 3, 1, 2))


def reference_forward(x_nchw, p):
    """Pure-JAX reference (matches PyTorch ResidualBlock.forward, train-mode BN)."""
    x = jnp.transpose(x_nchw, (0, 2, 3, 1))

    def conv(inp, wgt, pad):
        return lax.conv_general_dilated(
            inp, wgt, window_strides=(1, 1), padding=[(pad, pad), (pad, pad)],
            dimension_numbers=("NHWC", "HWIO", "NHWC"))

    def bn(inp, g, b):
        mu = jnp.mean(inp, axis=(0, 1, 2), keepdims=True)
        var = jnp.mean((inp - mu) ** 2, axis=(0, 1, 2), keepdims=True)
        return ((inp - mu) * lax.rsqrt(var + EPS)
                * g.reshape(1, 1, 1, -1) + b.reshape(1, 1, 1, -1))

    h1 = jax.nn.relu(bn(conv(x, p["w1"], 1), p["g1"], p["b1"]))
    left = bn(conv(h1, p["w2"], 1), p["g2"], p["b2"])
    cin, cout = p["ws"].shape
    short = bn(conv(x, p["ws"].reshape(1, 1, cin, cout), 0), p["gs"], p["bs"])
    out = jax.nn.relu(left + short)
    return jnp.transpose(out, (0, 3, 1, 2))


def init_params(key, cin, cout):
    ks = jax.random.split(key, 9)
    return {
        "w1": 0.2 * jax.random.normal(ks[0], (3, 3, cin, cout), jnp.float32),
        "w2": 0.2 * jax.random.normal(ks[1], (3, 3, cout, cout), jnp.float32),
        "ws": 0.2 * jax.random.normal(ks[2], (cin, cout), jnp.float32),
        "g1": 1.0 + 0.1 * jax.random.normal(ks[3], (1, cout), jnp.float32),
        "b1": 0.1 * jax.random.normal(ks[4], (1, cout), jnp.float32),
        "g2": 1.0 + 0.1 * jax.random.normal(ks[5], (1, cout), jnp.float32),
        "b2": 0.1 * jax.random.normal(ks[6], (1, cout), jnp.float32),
        "gs": 1.0 + 0.1 * jax.random.normal(ks[7], (1, cout), jnp.float32),
        "bs": 0.1 * jax.random.normal(ks[8], (1, cout), jnp.float32),
    }


if __name__ == "__main__":
    key = jax.random.PRNGKey(0)
    kx, kp = jax.random.split(key)

    N, CIN, COUT, H, W = 2, 4, 8, 16, 16   # inchannel != outchannel -> conv shortcut
    x = jax.random.normal(kx, (N, CIN, H, W), jnp.float32)
    params = init_params(kp, CIN, COUT)

    out = jax.block_until_ready(residual_block_forward(x, params))
    ref = jax.block_until_ready(reference_forward(x, params))

    assert out.shape == (N, COUT, H, W), out.shape
    max_err = float(jnp.max(jnp.abs(out - ref)))
    assert jnp.allclose(out, ref, atol=1e-4, rtol=1e-4), (
        "mismatch: max abs err = %g" % max_err)

    print("KERNEL_OK")
</pallas_src>

<mosaic_0001>
module attributes {stable_mosaic.version = 11 : i64} {
  func.func @residual_block_kernel(%arg0: memref<2x18x64xf32, #tpu.memory_space<vmem>>, %arg1: memref<3x64x256xf32, #tpu.memory_space<vmem>>, %arg2: memref<3x128x128xf32, #tpu.memory_space<vmem>>, %arg3: memref<256x256xf32, #tpu.memory_space<vmem>>, %arg4: memref<128x128xf32, #tpu.memory_space<vmem>>, %arg5: memref<2x384xf32, #tpu.memory_space<vmem>>, %arg6: memref<32x128xf32, #tpu.memory_space<vmem>>, %arg7: memref<2x18x128xf32, #tpu.memory_space<vmem>>) attributes {dimension_semantics = [], scalar_prefetch = 0 : i64, scratch_operands = 1 : i64, tpu.core_type = #tpu.core_type<tc>} {
    %c0 = arith.constant 0 : index
    %c0_0 = arith.constant 0 : index
    %c0_1 = arith.constant 0 : index
    %0 = vector.load %arg0[%c0, %c0_0, %c0_1] : memref<2x18x64xf32, #tpu.memory_space<vmem>>, vector<2x16x64xf32>
    %1 = vector.shape_cast %0 : vector<2x16x64xf32> to vector<32x64xf32>
    %c0_2 = arith.constant 0 : index
    %c0_3 = arith.constant 0 : index
    %c0_4 = arith.constant 0 : index
    %2 = vector.load %arg1[%c0_2, %c0_3, %c0_4] : memref<3x64x256xf32, #tpu.memory_space<vmem>>, vector<1x64x256xf32>
    %3 = vector.shape_cast %2 : vector<1x64x256xf32> to vector<64x256xf32>
    %cst = arith.constant dense<0.000000e+00> : vector<32x256xf32>
    %4 = tpu.matmul %1, %3, %cst {dimension_numbers = #tpu.dot_dimension_numbers<[1], [0], [0], [1], [0, 0, 1, 1], [], []>} : vector<32x64xf32>, vector<64x256xf32>, vector<32x256xf32> -> vector<32x256xf32>
    %c0_5 = arith.constant 0 : index
    %c1 = arith.constant 1 : index
    %c0_6 = arith.constant 0 : index
    %5 = vector.load %arg0[%c0_5, %c1, %c0_6] : memref<2x18x64xf32, #tpu.memory_space<vmem>>, vector<2x16x64xf32>
    %6 = vector.shape_cast %5 : vector<2x16x64xf32> to vector<32x64xf32>
    %c1_7 = arith.constant 1 : index
    %c0_8 = arith.constant 0 : index
    %c0_9 = arith.constant 0 : index
    %7 = vector.load %arg1[%c1_7, %c0_8, %c0_9] : memref<3x64x256xf32, #tpu.memory_space<vmem>>, vector<1x64x256xf32>
    %8 = vector.shape_cast %7 : vector<1x64x256xf32> to vector<64x256xf32>
    %cst_10 = arith.constant dense<0.000000e+00> : vector<32x256xf32>
    %9 = tpu.matmul %6, %8, %cst_10 {dimension_numbers = #tpu.dot_dimension_numbers<[1], [0], [0], [1], [0, 0, 1, 1], [], []>} : vector<32x64xf32>, vector<64x256xf32>, vector<32x256xf32> -> vector<32x256xf32>
    %10 = arith.addf %4, %9 : vector<32x256xf32>
    %c0_11 = arith.constant 0 : index
    %c2 = arith.constant 2 : index
    %c0_12 = arith.constant 0 : index
    %11 = vector.load %arg0[%c0_11, %c2, %c0_12] : memref<2x18x64xf32, #tpu.memory_space<vmem>>, vector<2x16x64xf32>
    %12 = vector.shape_cast %11 : vector<2x16x64xf32> to vector<32x64xf32>
    %c2_13 = arith.constant 2 : index
    %c0_14 = arith.constant 0 : index
    %c0_15 = arith.constant 0 : index
    %13 = vector.load %arg1[%c2_13, %c0_14, %c0_15] : memref<3x64x256xf32, #tpu.memory_space<vmem>>, vector<1x64x256xf32>
    %14 = vector.shape_cast %13 : vector<1x64x256xf32> to vector<64x256xf32>
    %cst_16 = arith.constant dense<0.000000e+00> : vector<32x256xf32>
    %15 = tpu.matmul %12, %14, %cst_16 {dimension_numbers = #tpu.dot_dimension_numbers<[1], [0], [0], [1], [0, 0, 1, 1], [], []>} : vector<32x64xf32>, vector<64x256xf32>, vector<32x256xf32> -> vector<32x256xf32>
    %16 = arith.addf %10, %15 : vector<32x256xf32>
    %c0_17 = arith.constant 0 : index
    %c0_18 = arith.constant 0 : index
    %17 = vector.load %arg3[%c0_17, %c0_18] : memref<256x256xf32, #tpu.memory_space<vmem>>, vector<256x256xf32>
    %c0_19 = arith.constant 0 : index
    %c0_20 = arith.constant 0 : index
    %18 = vector.load %arg5[%c0_19, %c0_20] : memref<2x384xf32, #tpu.memory_space<vmem>>, vector<1x256xf32>
    %c1_21 = arith.constant 1 : index
    %c0_22 = arith.constant 0 : index
    %19 = vector.load %arg5[%c1_21, %c0_22] : memref<2x384xf32, #tpu.memory_space<vmem>>, vector<1x256xf32>
    %cst_23 = arith.constant dense<0.000000e+00> : vector<256xf32>
    %20 = vector.multi_reduction <add>, %16, %cst_23 [0] : vector<32x256xf32> to vector<256xf32>
    %21 = vector.shape_cast %20 : vector<256xf32> to vector<1x256xf32>
    %cst_24 = arith.constant dense<0.000000e+00> : vector<1x256xf32>
    %22 = tpu.matmul %21, %17, %cst_24 {dimension_numbers = #tpu.dot_dimension_numbers<[1], [0], [0], [1], [0, 0, 1, 1], [], []>} : vector<1x256xf32>, vector<256x256xf32>, vector<1x256xf32> -> vector<1x256xf32>
    %cst_25 = arith.constant 0.001953125 : f32
    %23 = vector.broadcast %cst_25 : f32 to vector<1x256xf32>
    %24 = arith.mulf %22, %23 : vector<1x256xf32>
    %25 = vector.broadcast %24 : vector<1x256xf32> to vector<32x256xf32>
    %26 = arith.subf %16, %25 : vector<32x256xf32>
    %27 = arith.mulf %26, %26 : vector<32x256xf32>
    %cst_26 = arith.constant dense<0.000000e+00> : vector<256xf32>
    %28 = vector.multi_reduction <add>, %27, %cst_26 [0] : vector<32x256xf32> to vector<256xf32>
    %29 = vector.shape_cast %28 : vector<256xf32> to vector<1x256xf32>
    %cst_27 = arith.constant dense<0.000000e+00> : vector<1x256xf32>
    %30 = tpu.matmul %29, %17, %cst_27 {dimension_numbers = #tpu.dot_dimension_numbers<[1], [0], [0], [1], [0, 0, 1, 1], [], []>} : vector<1x256xf32>, vector<256x256xf32>, vector<1x256xf32> -> vector<1x256xf32>
    %cst_28 = arith.constant 0.001953125 : f32
    %31 = vector.broadcast %cst_28 : f32 to vector<1x256xf32>
    %32 = arith.mulf %30, %31 : vector<1x256xf32>
    %cst_29 = arith.constant 9.99999974E-6 : f32
    %33 = vector.broadcast %cst_29 : f32 to vector<1x256xf32>
    %34 = arith.addf %32, %33 : vector<1x256xf32>
    %35 = math.rsqrt %34 : vector<1x256xf32>
    %36 = arith.mulf %35, %18 : vector<1x256xf32>
    %37 = vector.broadcast %36 : vector<1x256xf32> to vector<32x256xf32>
    %38 = arith.mulf %26, %37 : vector<32x256xf32>
    %39 = vector.broadcast %19 : vector<1x256xf32> to vector<32x256xf32>
    %40 = arith.addf %38, %39 : vector<32x256xf32>
    %41 = vector.extract_strided_slice %40 {offsets = [0, 0], sizes = [32, 128], strides = [1, 1]} : vector<32x256xf32> to vector<32x128xf32>
    %cst_30 = arith.constant 0.000000e+00 : f32
    %42 = vector.broadcast %cst_30 : f32 to vector<32x128xf32>
    %43 = arith.maximumf %41, %42 : vector<32x128xf32>
    %44 = vector.extract_strided_slice %40 {offsets = [0, 128], sizes = [32, 128], strides = [1, 1]} : vector<32x256xf32> to vector<32x128xf32>
    %cst_31 = arith.constant 0.000000e+00 : f32
    %45 = vector.broadcast %cst_31 : f32 to vector<2x1x128xf32>
    %c0_32 = arith.constant 0 : index
    %c0_33 = arith.constant 0 : index
    %c0_34 = arith.constant 0 : index
    %46 = vector.load %arg7[%c0_32, %c0_33, %c0_34] : memref<2x18x128xf32, #tpu.memory_space<vmem>>, vector<2x1x128xf32>
    tpu.vector_store %arg7[%c0_32, %c0_33, %c0_34], %45 {strides = array<i32>} : memref<2x18x128xf32, #tpu.memory_space<vmem>>, vector<2x1x128xf32>,
    %c0_35 = arith.constant 0 : index
    %c17 = arith.constant 17 : index
    %c0_36 = arith.constant 0 : index
    %47 = vector.load %arg7[%c0_35, %c17, %c0_36] : memref<2x18x128xf32, #tpu.memory_space<vmem>>, vector<2x1x128xf32>
    tpu.vector_store %arg7[%c0_35, %c17, %c0_36], %45 {strides = array<i32>} : memref<2x18x128xf32, #tpu.memory_space<vmem>>, vector<2x1x128xf32>,
    %48 = vector.shape_cast %43 : vector<32x128xf32> to vector<2x16x128xf32>
    %c0_37 = arith.constant 0 : index
    %c1_38 = arith.constant 1 : index
    %c0_39 = arith.constant 0 : index
    %49 = vector.load %arg7[%c0_37, %c1_38, %c0_39] : memref<2x18x128xf32, #tpu.memory_space<vmem>>, vector<2x16x128xf32>
    tpu.vector_store %arg7[%c0_37, %c1_38, %c0_39], %48 {strides = array<i32>} : memref<2x18x128xf32, #tpu.memory_space<vmem>>, vector<2x16x128xf32>,
    %c0_40 = arith.constant 0 : index
    %c0_41 = arith.constant 0 : index
    %c0_42 = arith.constant 0 : index
    %50 = vector.load %arg7[%c0_40, %c0_41, %c0_42] : memref<2x18x128xf32, #tpu.memory_space<vmem>>, vector<2x16x128xf32>
    %51 = vector.shape_cast %50 : vector<2x16x128xf32> to vector<32x128xf32>
    %c0_43 = arith.constant 0 : index
    %c0_44 = arith.constant 0 : index
    %c0_45 = arith.constant 0 : index
    %52 = vector.load %arg2[%c0_43, %c0_44, %c0_45] : memref<3x128x128xf32, #tpu.memory_space<vmem>>, vector<1x128x128xf32>
    %53 = vector.shape_cast %52 : vector<1x128x128xf32> to vector<128x128xf32>
    %cst_46 = arith.constant dense<0.000000e+00> : vector<32x128xf32>
    %54 = tpu.matmul %51, %53, %cst_46 {dimension_numbers = #tpu.dot_dimension_numbers<[1], [0], [0], [1], [0, 0, 1, 1], [], []>} : vector<32x128xf32>, vector<128x128xf32>, vector<32x128xf32> -> vector<32x128xf32>
    %c0_47 = arith.constant 0 : index
    %c1_48 = arith.constant 1 : index
    %c0_49 = arith.constant 0 : index
    %55 = vector.load %arg7[%c0_47, %c1_48, %c0_49] : memref<2x18x128xf32, #tpu.memory_space<vmem>>, vector<2x16x128xf32>
    %56 = vector.shape_cast %55 : vector<2x16x128xf32> to vector<32x128xf32>
    %c1_50 = arith.constant 1 : index
    %c0_51 = arith.constant 0 : index
    %c0_52 = arith.constant 0 : index
    %57 = vector.load %arg2[%c1_50, %c0_51, %c0_52] : memref<3x128x128xf32, #tpu.memory_space<vmem>>, vector<1x128x128xf32>
    %58 = vector.shape_cast %57 : vector<1x128x128xf32> to vector<128x128xf32>
    %cst_53 = arith.constant dense<0.000000e+00> : vector<32x128xf32>
    %59 = tpu.matmul %56, %58, %cst_53 {dimension_numbers = #tpu.dot_dimension_numbers<[1], [0], [0], [1], [0, 0, 1, 1], [], []>} : vector<32x128xf32>, vector<128x128xf32>, vector<32x128xf32> -> vector<32x128xf32>
    %60 = arith.addf %54, %59 : vector<32x128xf32>
    %c0_54 = arith.constant 0 : index
    %c2_55 = arith.constant 2 : index
    %c0_56 = arith.constant 0 : index
    %61 = vector.load %arg7[%c0_54, %c2_55, %c0_56] : memref<2x18x128xf32, #tpu.memory_space<vmem>>, vector<2x16x128xf32>
    %62 = vector.shape_cast %61 : vector<2x16x128xf32> to vector<32x128xf32>
    %c2_57 = arith.constant 2 : index
    %c0_58 = arith.constant 0 : index
    %c0_59 = arith.constant 0 : index
    %63 = vector.load %arg2[%c2_57, %c0_58, %c0_59] : memref<3x128x128xf32, #tpu.memory_space<vmem>>, vector<1x128x128xf32>
    %64 = vector.shape_cast %63 : vector<1x128x128xf32> to vector<128x128xf32>
    %cst_60 = arith.constant dense<0.000000e+00> : vector<32x128xf32>
    %65 = tpu.matmul %62, %64, %cst_60 {dimension_numbers = #tpu.dot_dimension_numbers<[1], [0], [0], [1], [0, 0, 1, 1], [], []>} : vector<32x128xf32>, vector<128x128xf32>, vector<32x128xf32> -> vector<32x128xf32>
    %66 = arith.addf %60, %65 : vector<32x128xf32>
    %c0_61 = arith.constant 0 : index
    %c0_62 = arith.constant 0 : index
    %67 = vector.load %arg4[%c0_61, %c0_62] : memref<128x128xf32, #tpu.memory_space<vmem>>, vector<128x128xf32>
    %c0_63 = arith.constant 0 : index
    %c256 = arith.constant 256 : index
    %68 = vector.load %arg5[%c0_63, %c256] : memref<2x384xf32, #tpu.memory_space<vmem>>, vector<1x128xf32>
    %c1_64 = arith.constant 1 : index
    %c256_65 = arith.constant 256 : index
    %69 = vector.load %arg5[%c1_64, %c256_65] : memref<2x384xf32, #tpu.memory_space<vmem>>, vector<1x128xf32>
    %cst_66 = arith.constant dense<0.000000e+00> : vector<128xf32>
    %70 = vector.multi_reduction <add>, %66, %cst_66 [0] : vector<32x128xf32> to vector<128xf32>
    %71 = vector.shape_cast %70 : vector<128xf32> to vector<1x128xf32>
    %cst_67 = arith.constant dense<0.000000e+00> : vector<1x128xf32>
    %72 = tpu.matmul %71, %67, %cst_67 {dimension_numbers = #tpu.dot_dimension_numbers<[1], [0], [0], [1], [0, 0, 1, 1], [], []>} : vector<1x128xf32>, vector<128x128xf32>, vector<1x128xf32> -> vector<1x128xf32>
    %cst_68 = arith.constant 0.001953125 : f32
    %73 = vector.broadcast %cst_68 : f32 to vector<1x128xf32>
    %74 = arith.mulf %72, %73 : vector<1x128xf32>
    %75 = vector.broadcast %74 : vector<1x128xf32> to vector<32x128xf32>
    %76 = arith.subf %66, %75 : vector<32x128xf32>
    %77 = arith.mulf %76, %76 : vector<32x128xf32>
    %cst_69 = arith.constant dense<0.000000e+00> : vector<128xf32>
    %78 = vector.multi_reduction <add>, %77, %cst_69 [0] : vector<32x128xf32> to vector<128xf32>
    %79 = vector.shape_cast %78 : vector<128xf32> to vector<1x128xf32>
    %cst_70 = arith.constant dense<0.000000e+00> : vector<1x128xf32>
    %80 = tpu.matmul %79, %67, %cst_70 {dimension_numbers = #tpu.dot_dimension_numbers<[1], [0], [0], [1], [0, 0, 1, 1], [], []>} : vector<1x128xf32>, vector<128x128xf32>, vector<1x128xf32> -> vector<1x128xf32>
    %cst_71 = arith.constant 0.001953125 : f32
    %81 = vector.broadcast %cst_71 : f32 to vector<1x128xf32>
    %82 = arith.mulf %80, %81 : vector<1x128xf32>
    %cst_72 = arith.constant 9.99999974E-6 : f32
    %83 = vector.broadcast %cst_72 : f32 to vector<1x128xf32>
    %84 = arith.addf %82, %83 : vector<1x128xf32>
    %85 = math.rsqrt %84 : vector<1x128xf32>
    %86 = arith.mulf %85, %68 : vector<1x128xf32>
    %87 = vector.broadcast %86 : vector<1x128xf32> to vector<32x128xf32>
    %88 = arith.mulf %76, %87 : vector<32x128xf32>
    %89 = vector.broadcast %69 : vector<1x128xf32> to vector<32x128xf32>
    %90 = arith.addf %88, %89 : vector<32x128xf32>
    %91 = arith.addf %90, %44 : vector<32x128xf32>
    %cst_73 = arith.constant 0.000000e+00 : f32
    %92 = vector.broadcast %cst_73 : f32 to vector<32x128xf32>
    %93 = arith.maximumf %91, %92 : vector<32x128xf32>
    %c0_74 = arith.constant 0 : index
    %c0_75 = arith.constant 0 : index
    %94 = vector.load %arg6[%c0_74, %c0_75] : memref<32x128xf32, #tpu.memory_space<vmem>>, vector<32x128xf32>
    tpu.vector_store %arg6[%c0_74, %c0_75], %93 {strides = array<i32>} : memref<32x128xf32, #tpu.memory_space<vmem>>, vector<32x128xf32>,
    return
  }
}

</mosaic_0001>

<bundles_post_ra>
// kernel: tpu_custom_call.1
= control target key start
LH: loop header
LB: loop body
LE: loop exit
PB: predicated region body
PF: predicated region fallthrough
CT: control target
= control target key end

     0   :  { %11 = vsyncpa [#allocation4], 0  ;;  %s2468_s0 = inlined_call_operand.vmem [shape: f32[2,18,64], index: 0, kind: input, shape index: {}]   ;;  %s2469_s1 = inlined_call_operand.hbm [shape: f32[3,64,256], index: 1, kind: input, shape index: {}]   ;;  %s2470_s2 = inlined_call_operand.hbm [shape: f32[3,128,128], index: 2, kind: input, shape index: {}]   ;;  %s2471_s3 = inlined_call_operand.hbm [shape: f32[256,256], index: 3, kind: input, shape index: {}]   ;;  %s2472_s4 = inlined_call_operand.hbm [shape: f32[128,128], index: 4, kind: input, shape index: {}]   ;;  %s2473_s5 = inlined_call_operand.vmem [shape: f32[2,384], index: 5, kind: input, shape index: {}]   ;;  %s2474_s6 = inlined_call_operand.hbm [shape: f32[32,128], index: 6, kind: output, shape index: {}]  }
   0x1   :  { %12 = vsyncpa [#allocation7], 0 }
   0x2   :  { %13 = vsyncpa [#allocation10], 0 }
   0x3   :  { %14 = vsyncpa [#allocation5], 0  ;;  %s2123_s21 = smov [#allocation6]   ;;  %s2005_s25 = scalar_lea.hbm %s2470_s2, 6144 }
   0x4   :  { %s34_s22 = sshll.u32 %s2123_s21, 4  ;;  %p2006_p0 = scmp.ne.s32.totalorder %s2470_s2, %s2005_s25  ;;  %s35_s22 = int_to_ptr.vmem [resolvable:$true] %s34_s22 }
   0x5   :  { %p2009_p1 = scmp.lt.u32.totalorder %s2005_s25, %s2470_s2 }
   0x7   :  { %p2011_p2 = pnand %p2009_p1, %p2006_p0 }
   0x9   :  { %2014 = shalt.err (!%p2011_p2)
}
   0xa   :  { %s2015_s30 = scalar_lea.vmem %s35_s22, 6144  ;;  %p2020_p4 = scmp.lt.s32.totalorder %s35_s22, %s35_s22 }
   0xb   :  { %p2016_p3 = scmp.ne.s32.totalorder %s35_s22, %s2015_s30  ;;  %p2021_p5 = scmp.lt.s32.totalorder %s2015_s30, %s2015_s30 }
   0xd   :  { %p2022_p6 = por %p2021_p5, %p2020_p4 }
   0xf   :  { %p2023_p7 = pnand %p2022_p6, %p2016_p3 }
  0x11   :  { %2026 = shalt.err (!%p2023_p7)
}
  0x12   :  { %s2124_s7 = smov 128   ;;  %s2125_s8 = smov 8  }
  0x13   :  { %40 = dma.hbm_to_vmem [thread:$0]  %s2470_s2, 6144, %s35_s22, [#allocation7], %s2124_s7, %s2124_s7, %s2125_s8  }
  0x14   :  { %s2126_s11 = smov [#allocation3]   ;;  %s2027_s15 = scalar_lea.hbm %s2469_s1, 6144 }
  0x15   :  { %s22_s12 = sshll.u32 %s2126_s11, 4  ;;  %p2028_p8 = scmp.ne.s32.totalorder %s2469_s1, %s2027_s15  ;;  %s23_s12 = int_to_ptr.vmem [resolvable:$true] %s22_s12 }
  0x16   :  { %p2031_p9 = scmp.lt.u32.totalorder %s2027_s15, %s2469_s1 }
  0x18   :  { %p2033_p10 = pnand %p2031_p9, %p2028_p8 }
  0x1a   :  { %2036 = shalt.err (!%p2033_p10)
}
  0x1b   :  { %s2037_s20 = scalar_lea.vmem %s23_s12, 6144  ;;  %p2042_p12 = scmp.lt.s32.totalorder %s23_s12, %s23_s12 }
  0x1c   :  { %p2038_p11 = scmp.ne.s32.totalorder %s23_s12, %s2037_s20  ;;  %p2043_p13 = scmp.lt.s32.totalorder %s2037_s20, %s2037_s20 }
  0x1e   :  { %p2044_p0 = por %p2043_p13, %p2042_p12 }
  0x20   :  { %p2045_p1 = pnand %p2044_p0, %p2038_p11 }
  0x22   :  { %2048 = shalt.err (!%p2045_p1)
}
  0x23   :  { %s2127_s2 = smov 256   ;;  %s2128_s21 = smov 16  }
  0x24   :  { %28 = dma.hbm_to_vmem [thread:$0]  %s2469_s1, 6144, %s23_s12, [#allocation4], %s2127_s2, %s2127_s2, %s2128_s21  }
  0x25   :  { %s2129_s24 = smov [#allocation8]   ;;  %s2130_s26 = smov [#allocation9]  }
  0x26   :  { %s46_s25 = sshll.u32 %s2129_s24, 4  ;;  %s58_s27 = sshll.u32 %s2130_s26, 4  ;;  %s47_s25 = int_to_ptr.vmem [resolvable:$true] %s46_s25  ;;  %s2197_s27 = int_to_ptr.vmem [resolvable:$true] %s58_s27 }
  0x27   :  { %s2049_s30 = scalar_lea.hbm %s2471_s3, 8192 }
  0x28   :  { %p2050_p2 = scmp.ne.s32.totalorder %s2471_s3, %s2049_s30  ;;  %p2053_p3 = scmp.lt.u32.totalorder %s2049_s30, %s2471_s3 }
  0x2a   :  { %p2055_p4 = pnand %p2053_p3, %p2050_p2 }
  0x2c   :  { %2058 = shalt.err (!%p2055_p4)
}
  0x2d   :  { %s2059_s1 = scalar_lea.vmem %s47_s25, 8192  ;;  %p2064_p6 = scmp.lt.s32.totalorder %s47_s25, %s47_s25 }
  0x2e   :  { %p2060_p5 = scmp.ne.s32.totalorder %s47_s25, %s2059_s1  ;;  %p2065_p7 = scmp.lt.s32.totalorder %s2059_s1, %s2059_s1 }
  0x30   :  { %p2066_p8 = por %p2065_p7, %p2064_p6 }
  0x32   :  { %p2067_p9 = pnand %p2066_p8, %p2060_p5 }
  0x34   :  { %2070 = shalt.err (!%p2067_p9)
}
  0x35   :  { %52 = dma.hbm_to_vmem [thread:$0]  %s2471_s3, 8192, %s47_s25, [#allocation7], %s2127_s2, %s2127_s2, %s2128_s21  }
  0x36   :  { %s2071_s17 = scalar_lea.hbm %s2472_s4, 2048 }
  0x37   :  { %p2072_p10 = scmp.ne.s32.totalorder %s2472_s4, %s2071_s17  ;;  %p2075_p11 = scmp.lt.u32.totalorder %s2071_s17, %s2472_s4 }
  0x39   :  { %p2077_p12 = pnand %p2075_p11, %p2072_p10 }
  0x3b   :  { %2080 = shalt.err (!%p2077_p12)
}
  0x3c   :  { %s2081_s23 = scalar_lea.vmem %s2197_s27, 2048  ;;  %p2086_p0 = scmp.lt.s32.totalorder %s2197_s27, %s2197_s27 }
  0x3d   :  { %p2082_p13 = scmp.ne.s32.totalorder %s2197_s27, %s2081_s23  ;;  %p2087_p1 = scmp.lt.s32.totalorder %s2081_s23, %s2081_s23 }
  0x3f   :  { %p2088_p2 = por %p2087_p1, %p2086_p0 }
  0x41   :  { %p2089_p3 = pnand %p2088_p2, %p2082_p13 }
  0x43   :  { %2092 = shalt.err (!%p2089_p3)
}
  0x44   :  { %64 = dma.hbm_to_vmem [thread:$0]  %s2472_s4, 2048, %s2197_s27, [#allocation10], %s2124_s7, %s2124_s7, %s2125_s8  }
  0x45   :  { %2115 = dma.done.wait [#allocation4], 6144  }
  0x46   :  { %2116 = vsyncadd [#allocation4], 4294961152 }
  0x47   :  { %2117 = dma.done.wait [#allocation7], 14336  }
  0x48   :  { %2118 = vsyncadd [#allocation7], 4294952960 }
  0x49   :  { %2119 = dma.done.wait [#allocation10], 2048  }
  0x4a   :  { %2120 = vsyncadd [#allocation10], 4294965248  ;;  %v2131_v0 = vmov 0.0   ;;  %v105_v1 = vld [vmem:[#allocation3 + $0x88] sm:$0xff]  ;;  %v107_v2 = vld [vmem:[#allocation3 + $0x98] sm:$0xff]  ;;  %vm120_vm0 = vcmask 523264  }
  0x4b   :  { %197 = vmatprep.mubr.f32.mxu0 %v2131_v0  ;;  %782 = vst [vmem:[#allocation2] sm:$0x1] %v2131_v0  ;;  %783 = vst [vmem:[#allocation2 + $0x18] sm:$0x1] %v2131_v0  ;;  %v104_v3 = vld [vmem:[#allocation3 + $0x80] sm:$0xff]  ;;  %v1643_v4 = vpack.c.bf16 %v107_v2, %v105_v1  ;;  %v106_v5 = vld [vmem:[#allocation3 + $0x90] sm:$0xff] }
  0x4c   :  { %784 = vst [vmem:[#allocation2 + $0x11] sm:$0x1] %v2131_v0  ;;  %785 = vst [vmem:[#allocation2 + $0x29] sm:$0x1] %v2131_v0  ;;  %v109_v6 = vld [vmem:[#allocation3 + $0xa8] sm:$0xff]  ;;  %v111_v7 = vld [vmem:[#allocation3 + $0xb8] sm:$0xff]  ;;  %v1645_v8 = vpack.c.bf16 %v106_v5, %v104_v3 }
  0x4d   :  { %v1647_v9 = vpack.c.bf16 %v111_v7, %v109_v6  ;;  %v108_v10 = vld [vmem:[#allocation3 + $0xa0] sm:$0xff]  ;;  %v110_v11 = vld [vmem:[#allocation3 + $0xb0] sm:$0xff]  ;;  %v113_v12 = vld [vmem:[#allocation3 + $0xc8] sm:$0xff]  ;;  %1644 = vmatprep.subr.bf16.mxu0 %v1643_v4  ;;  %vm2133_vm1 = vmmov 0   ;;  %s2134_s27 = smov [#allocation11]  }
  0x4e   :  { %v115_v13 = vld [vmem:[#allocation3 + $0xd8] sm:$0xff]  ;;  %1646 = vmatpush1.bf16.msra.mxu0 %v1645_v8  ;;  %v1649_v14 = vpack.c.bf16 %v110_v11, %v108_v10  ;;  %v112_v16 = vld [vmem:[#allocation3 + $0xc0] sm:$0xff]  ;;  %v114_v17 = vld [vmem:[#allocation3 + $0xd0] sm:$0xff]  ;;  %s1337_s28 = sshll.u32 %s2134_s27, 4  ;;  %s1338_s28 = int_to_ptr.vmem [resolvable:$true] %s1337_s28 }
  0x4f   :  { %1648 = vmatprep.subr.bf16.mxu0 %v1647_v9  ;;  %v1651_v15 = vpack.c.bf16 %v115_v13, %v113_v12  ;;  %v117_v18 = vld [vmem:[#allocation3 + $0xe8] sm:$0xff]  ;;  %v119_v19 = vld [vmem:[#allocation3 + $0xf8] sm:$0xff]  ;;  %v1653_v20 = vpack.c.bf16 %v114_v17, %v112_v16  ;;  %v116_v22 = vld [vmem:[#allocation3 + $0xe0] sm:$0xff]  ;;  %p2098_p5 = scmp.lt.s32.totalorder %s1338_s28, %s1338_s28 }
  0x50   :  { %v1655_v21 = vpack.c.bf16 %v119_v19, %v117_v18  ;;  %v118_v23 = vld [vmem:[#allocation3 + $0xf0] sm:$0xff]  ;;  %v84_v24 = vld [vmem:[#allocation3 + $0x8] sm:$0xff]  ;;  %v86_v25 = vld [vmem:[#allocation3 + $0x18] sm:$0xff] }
  0x51   :  { %v1657_v26 = vpack.c.bf16 %v118_v23, %v116_v22  ;;  %v1659_v27 = vpack.c.bf16 %v86_v25, %v84_v24  ;;  %v83_v28 = vld [vmem:[#allocation3] sm:$0xff]  ;;  %v85_v29 = vld [vmem:[#allocation3 + $0x10] sm:$0xff]  ;;  %v88_v30 = vld [vmem:[#allocation3 + $0x28] sm:$0xff] }
  0x52   :  { %1650 = vmatpush1.bf16.msra.mxu0 %v1649_v14  ;;  %v90_v31 = vld [vmem:[#allocation3 + $0x38] sm:$0xff]  ;;  %v1661_v33 = vpack.c.bf16 %v85_v29, %v83_v28  ;;  %v87_v35 = vld [vmem:[#allocation3 + $0x20] sm:$0xff]  ;;  %v89_v36 = vld [vmem:[#allocation3 + $0x30] sm:$0xff] }
  0x53   :  { %1652 = vmatprep.subr.bf16.mxu0 %v1651_v15  ;;  %v99_v32 = vld [vmem:[%s2468_s0 + $0x1] sm:$0xff]  ;;  %v1663_v34 = vpack.c.bf16 %v90_v31, %v88_v30  ;;  %v92_v37 = vld [vmem:[#allocation3 + $0x48] sm:$0xff]  ;;  %v100_v39 = vld [vmem:[%s2468_s0 + $0x9] sm:$0xff]  ;;  %v1665_v42 = vpack.c.bf16 %v89_v36, %v87_v35 }
  0x54   :  { %v94_v38 = vld [vmem:[#allocation3 + $0x58] sm:$0xff]  ;;  %v91_v40 = vld [vmem:[#allocation3 + $0x40] sm:$0xff]  ;;  %v93_v41 = vld [vmem:[#allocation3 + $0x50] sm:$0xff] }
  0x55   :  { %v96_v43 = vld [vmem:[#allocation3 + $0x68] sm:$0xff]  ;;  %v456_v45 = vld [vmem:[#allocation8 + $0x18] sm:$0xff]  ;;  %v453_v46 = vld [vmem:[#allocation8] sm:$0xff]  ;;  %v1667_v47 = vpack.c.bf16 %v94_v38, %v92_v37  ;;  %v1669_v60 = vpack.c.bf16 %v93_v41, %v91_v40 }
  0x56   :  { %1654 = vmatpush1.bf16.msra.mxu0 %v1653_v20  ;;  %v454_v44 = vld [vmem:[#allocation8 + $0x8] sm:$0xff]  ;;  %v455_v49 = vld [vmem:[#allocation8 + $0x10] sm:$0xff]  ;;  %v460_v51 = vld [vmem:[#allocation8 + $0x38] sm:$0xff] }
  0x57   :  { %1656 = vmatprep.subr.bf16.mxu0 %v1655_v21  ;;  %v2244_v48 = vpack.c.bf16 %v456_v45, %v454_v44  ;;  %v458_v50 = vld [vmem:[#allocation8 + $0x28] sm:$0xff]  ;;  %v98_v52 = vld [vmem:[#allocation3 + $0x78] sm:$0xff]  ;;  %v2246_v53 = vpack.c.bf16 %v455_v49, %v453_v46  ;;  %v457_v55 = vld [vmem:[#allocation8 + $0x20] sm:$0xff] }
  0x58   :  { %v2248_v54 = vpack.c.bf16 %v460_v51, %v458_v50  ;;  %v459_v56 = vld [vmem:[#allocation8 + $0x30] sm:$0xff]  ;;  %v462_v57 = vld [vmem:[#allocation8 + $0x48] sm:$0xff]  ;;  %v464_v58 = vld [vmem:[#allocation8 + $0x58] sm:$0xff]  ;;  %v1671_v61 = vpack.c.bf16 %v98_v52, %v96_v43 }
  0x59   :  { %1692 = vmatprep.subr.bf16.mxu1 %v2244_v48  ;;  %v101_v59 = vld [vmem:[%s2468_s0 + $0x19] sm:$0xff]  ;;  %v95_v62 = vld [vmem:[#allocation3 + $0x60] sm:$0xff]  ;;  %v2257_v2 = vpack.c.bf16 %v459_v56, %v457_v55  ;;  %v331_v3 = vld [vmem:[#allocation3 + $0x118] sm:$0xff]  ;;  %v2260_v4 = vpack.c.bf16 %v464_v58, %v462_v57 }
  0x5a   :  { %1658 = vmatpush1.bf16.msra.mxu0 %v1657_v26  ;;  %v97_v63 = vld [vmem:[#allocation3 + $0x70] sm:$0xff]  ;;  %v329_v1 = vld [vmem:[#allocation3 + $0x108] sm:$0xff]  ;;  %1694 = vmatpush1.bf16.msra.mxu1 %v2246_v53  ;;  %v461_v5 = vld [vmem:[#allocation8 + $0x40] sm:$0xff] }
  0x5b   :  { %1660 = vmatprep.subr.bf16.mxu0 %v1659_v27  ;;  %1696 = vmatprep.subr.bf16.mxu1 %v2248_v54  ;;  %v463_v6 = vld [vmem:[#allocation8 + $0x50] sm:$0xff]  ;;  %v466_v7 = vld [vmem:[#allocation8 + $0x68] sm:$0xff]  ;;  %v468_v8 = vld [vmem:[#allocation8 + $0x78] sm:$0xff]  ;;  %v1673_v10 = vpack.c.bf16 %v97_v63, %v95_v62  ;;  %v1675_v11 = vpack.c.bf16 %v331_v3, %v329_v1 }
  0x5c   :  { %v102_v9 = vld [vmem:[%s2468_s0 + $0x21] sm:$0xff]  ;;  %v328_v12 = vld [vmem:[#allocation3 + $0x100] sm:$0xff]  ;;  %v333_v14 = vld [vmem:[#allocation3 + $0x128] sm:$0xff]  ;;  %v2268_v15 = vpack.c.bf16 %v463_v6, %v461_v5  ;;  %v2271_v17 = vpack.c.bf16 %v468_v8, %v466_v7 }
  0x5d   :  { %1351 = vmatmul.mubr.msk.f32.vlgmr.msra.gmra.mrb[0].mxu0 %vm120_vm0, %v99_v32  ;;  %v330_v13 = vld [vmem:[#allocation3 + $0x110] sm:$0xff]  ;;  %v335_v16 = vld [vmem:[#allocation3 + $0x138] sm:$0xff]  ;;  %v465_v18 = vld [vmem:[#allocation8 + $0x60] sm:$0xff] }
  0x5e   :  { %1662 = vmatpush1.bf16.msra.mxu0 %v1661_v33  ;;  %203 = vmatprep.mubr.f32.mxu0 %v2131_v0  ;;  %v467_v19 = vld [vmem:[#allocation8 + $0x70] sm:$0xff]  ;;  %v470_v20 = vld [vmem:[#allocation8 + $0x88] sm:$0xff]  ;;  %v472_v21 = vld [vmem:[#allocation8 + $0x98] sm:$0xff]  ;;  %v1677_v23 = vpack.c.bf16 %v330_v13, %v328_v12  ;;  %v1679_v24 = vpack.c.bf16 %v335_v16, %v333_v14 }
  0x5f   :  { %1664 = vmatprep.subr.bf16.mxu0 %v1663_v34  ;;  %1698 = vmatpush1.bf16.msra.mxu1 %v2257_v2  ;;  %v79_v22 = vld [vmem:[%s2468_s0] sm:$0xff]  ;;  %v332_v25 = vld [vmem:[#allocation3 + $0x120] sm:$0xff]  ;;  %v337_v27 = vld [vmem:[#allocation3 + $0x148] sm:$0xff]  ;;  %v2279_v28 = vpack.c.bf16 %v467_v19, %v465_v18  ;;  %v2282_v30 = vpack.c.bf16 %v472_v21, %v470_v20 }
  0x60   :  { %1700 = vmatprep.subr.bf16.mxu1 %v2260_v4  ;;  %v334_v26 = vld [vmem:[#allocation3 + $0x130] sm:$0xff]  ;;  %v339_v29 = vld [vmem:[#allocation3 + $0x158] sm:$0xff]  ;;  %v469_v31 = vld [vmem:[#allocation8 + $0x80] sm:$0xff] }
  0x61   :  { %1352 = vmatmul.mubr.msk.f32.gmra.mrb[2].mxu0 %vm120_vm0, %v100_v39  ;;  %v471_v32 = vld [vmem:[#allocation8 + $0x90] sm:$0xff]  ;;  %v474_v33 = vld [vmem:[#allocation8 + $0xa8] sm:$0xff]  ;;  %v476_v34 = vld [vmem:[#allocation8 + $0xb8] sm:$0xff]  ;;  %v1681_v36 = vpack.c.bf16 %v334_v26, %v332_v25  ;;  %v1683_v37 = vpack.c.bf16 %v339_v29, %v337_v27 }
  0x62   :  { %1666 = vmatpush1.bf16.msra.mxu0 %v1665_v42  ;;  %209 = vmatprep.mubr.f32.mxu0 %v2131_v0  ;;  %v80_v35 = vld [vmem:[%s2468_s0 + $0x8] sm:$0xff]  ;;  %v336_v38 = vld [vmem:[#allocation3 + $0x140] sm:$0xff]  ;;  %v338_v39 = vld [vmem:[#allocation3 + $0x150] sm:$0xff]  ;;  %v2290_v41 = vpack.c.bf16 %v471_v32, %v469_v31  ;;  %v2293_v43 = vpack.c.bf16 %v476_v34, %v474_v33 }
  0x63   :  { %1668 = vmatprep.subr.bf16.mxu0 %v1667_v47  ;;  %1702 = vmatpush1.bf16.msra.mxu1 %v2268_v15  ;;  %v341_v40 = vld [vmem:[#allocation3 + $0x168] sm:$0xff]  ;;  %v343_v42 = vld [vmem:[#allocation3 + $0x178] sm:$0xff]  ;;  %v473_v44 = vld [vmem:[#allocation8 + $0xa0] sm:$0xff]  ;;  %v1685_v50 = vpack.c.bf16 %v338_v39, %v336_v38 }
  0x64   :  { %1704 = vmatprep.subr.bf16.mxu1 %v2271_v17  ;;  %v475_v45 = vld [vmem:[#allocation8 + $0xb0] sm:$0xff]  ;;  %v478_v46 = vld [vmem:[#allocation8 + $0xc8] sm:$0xff]  ;;  %v480_v47 = vld [vmem:[#allocation8 + $0xd8] sm:$0xff]  ;;  %v1687_v51 = vpack.c.bf16 %v343_v42, %v341_v40 }
  0x65   :  { %1353 = vmatmul.mubr.msk.f32.gmra.mrb[4].mxu0 %vm120_vm0, %v101_v59  ;;  %v81_v49 = vld [vmem:[%s2468_s0 + $0x18] sm:$0xff]  ;;  %v340_v52 = vld [vmem:[#allocation3 + $0x160] sm:$0xff]  ;;  %v342_v55 = vld [vmem:[#allocation3 + $0x170] sm:$0xff]  ;;  %v1713_v56 = vpack.c.bf16 %v475_v45, %v473_v44  ;;  %v1715_v57 = vpack.c.bf16 %v480_v47, %v478_v46 }
  0x66   :  { %1670 = vmatpush1.bf16.msra.mxu0 %v1669_v60  ;;  %215 = vmatprep.mubr.f32.mxu0 %v2131_v0  ;;  %v477_v58 = vld [vmem:[#allocation8 + $0xc0] sm:$0xff]  ;;  %v479_v59 = vld [vmem:[#allocation8 + $0xd0] sm:$0xff]  ;;  %v482_v60 = vld [vmem:[#allocation8 + $0xe8] sm:$0xff]  ;;  %v1689_v63 = vpack.c.bf16 %v342_v55, %v340_v52 }
  0x67   :  { %1672 = vmatprep.subr.bf16.mxu0 %v1671_v61  ;;  %1706 = vmatpush1.bf16.msra.mxu1 %v2279_v28  ;;  %v484_v61 = vld [vmem:[#allocation8 + $0xf8] sm:$0xff]  ;;  %v82_v62 = vld [vmem:[%s2468_s0 + $0x20] sm:$0xff]  ;;  %v1717_v1 = vpack.c.bf16 %v479_v59, %v477_v58  ;;  %v481_v5 = vld [vmem:[#allocation8 + $0xe0] sm:$0xff] }
  0x68   :  { %1708 = vmatprep.subr.bf16.mxu1 %v2282_v30  ;;  %v1719_v3 = vpack.c.bf16 %v484_v61, %v482_v60  ;;  %v483_v6 = vld [vmem:[#allocation8 + $0xf0] sm:$0xff]  ;;  %v486_v7 = vld [vmem:[#allocation8 + $0x108] sm:$0xff]  ;;  %v488_v8 = vld [vmem:[#allocation8 + $0x118] sm:$0xff] }
  0x69   :  { %1354 = vmatmul.mubr.msk.f32.gmra.mrb[6].mxu0 %vm120_vm0, %v102_v9  ;;  %v323_v9 = vld [vmem:[%s2468_s0 + $0x2] sm:$0xff]  ;;  %v485_v12 = vld [vmem:[#allocation8 + $0x100] sm:$0xff]  ;;  %v494_v19 = vld [vmem:[#allocation8 + $0x148] sm:$0xff] }
  0x6a   :  { %1674 = vmatpush1.bf16.msra.mxu0 %v1673_v10  ;;  %298 = vmatprep.mubr.f32.mxu0 %v2131_v0  ;;  %v1721_v10 = vpack.c.bf16 %v483_v6, %v481_v5  ;;  %v487_v13 = vld [vmem:[#allocation8 + $0x110] sm:$0xff]  ;;  %v324_v14 = vld [vmem:[%s2468_s0 + $0xa] sm:$0xff]  ;;  %v498_v25 = vld [vmem:[#allocation8 + $0x168] sm:$0xff] }
  0x6b   :  { %1676 = vmatprep.subr.bf16.mxu0 %v1675_v11  ;;  %1710 = vmatpush1.bf16.msra.mxu1 %v2290_v41  ;;  %v1723_v11 = vpack.c.bf16 %v488_v8, %v486_v7  ;;  %v1725_v16 = vpack.c.bf16 %v487_v13, %v485_v12  ;;  %v496_v20 = vld [vmem:[#allocation8 + $0x158] sm:$0xff]  ;;  %v499_v29 = vld [vmem:[#allocation8 + $0x170] sm:$0xff]  ;;  %v502_v31 = vld [vmem:[#allocation8 + $0x188] sm:$0xff] }
  0x6c   :  { %1712 = vmatprep.subr.bf16.mxu1 %v2293_v43  ;;  %v1731_v21 = vpack.c.bf16 %v496_v20, %v494_v19  ;;  %v500_v26 = vld [vmem:[#allocation8 + $0x178] sm:$0xff]  ;;  %v501_v34 = vld [vmem:[#allocation8 + $0x180] sm:$0xff]  ;;  %v511_v47 = vld [vmem:[#allocation8 + $0x1d0] sm:$0xff] }
  0x6d   :  { %1355 = vmatmul.mubr.msk.f32.vlgmr.msra.gmra.mrb[0].mxu0 %vm120_vm0, %v79_v22  ;;  %v493_v22 = vld [vmem:[#allocation8 + $0x140] sm:$0xff]  ;;  %v1735_v27 = vpack.c.bf16 %v500_v26, %v498_v25  ;;  %v504_v32 = vld [vmem:[#allocation8 + $0x198] sm:$0xff] }
  0x6e   :  { %1678 = vmatpush1.bf16.msra.mxu0 %v1677_v23  ;;  %304 = vmatprep.mubr.f32.mxu0 %v2131_v0  ;;  %v495_v23 = vld [vmem:[#allocation8 + $0x150] sm:$0xff]  ;;  %v1739_v33 = vpack.c.bf16 %v504_v32, %v502_v31  ;;  %v508_v38 = vld [vmem:[#allocation8 + $0x1b8] sm:$0xff]  ;;  %v505_v40 = vld [vmem:[#allocation8 + $0x1a0] sm:$0xff] }
  0x6f   :  { %1680 = vmatprep.subr.bf16.mxu0 %v1679_v24  ;;  %1714 = vmatpush1.bf16.msra.mxu1 %v1713_v56  ;;  %v1733_v24 = vpack.c.bf16 %v495_v23, %v493_v22  ;;  %v512_v44 = vld [vmem:[#allocation8 + $0x1d8] sm:$0xff]  ;;  %v509_v46 = vld [vmem:[#allocation8 + $0x1c0] sm:$0xff] }
  0x70   :  { %1716 = vmatprep.subr.bf16.mxu1 %v1715_v57  ;;  %v513_v52 = vld [vmem:[#allocation8 + $0x1e0] sm:$0xff] }
  0x71   :  { %1356 = vmatmul.mubr.msk.f32.gmra.mrb[2].mxu0 %vm120_vm0, %v80_v35  ;;  %v503_v35 = vld [vmem:[#allocation8 + $0x190] sm:$0xff] }
  0x72   :  { %1682 = vmatpush1.bf16.msra.mxu0 %v1681_v36  ;;  %310 = vmatprep.mubr.f32.mxu0 %v2131_v0  ;;  %v1741_v36 = vpack.c.bf16 %v503_v35, %v501_v34 }
  0x73   :  { %1684 = vmatprep.subr.bf16.mxu0 %v1683_v37  ;;  %1718 = vmatpush1.bf16.msra.mxu1 %v1717_v1  ;;  %v506_v37 = vld [vmem:[#allocation8 + $0x1a8] sm:$0xff] }
  0x74   :  { %1720 = vmatprep.subr.bf16.mxu1 %v1719_v3  ;;  %v1743_v39 = vpack.c.bf16 %v508_v38, %v506_v37 }
  0x75   :  { %1357 = vmatmul.mubr.msk.f32.gmra.mrb[4].mxu0 %vm120_vm0, %v81_v49  ;;  %v1749_v49 = vpack.c.bf16 %v511_v47, %v509_v46 }
  0x76   :  { %1686 = vmatpush1.bf16.msra.mxu0 %v1685_v50  ;;  %316 = vmatprep.mubr.f32.mxu0 %v2131_v0  ;;  %v514_v50 = vld [vmem:[#allocation8 + $0x1e8] sm:$0xff] }
  0x77   :  { %1688 = vmatprep.subr.bf16.mxu0 %v1687_v51  ;;  %1722 = vmatpush1.bf16.msra.mxu1 %v1721_v10  ;;  %v516_v51 = vld [vmem:[#allocation8 + $0x1f8] sm:$0xff] }
  0x78   :  { %1724 = vmatprep.subr.bf16.mxu1 %v1723_v11  ;;  %v1751_v55 = vpack.c.bf16 %v516_v51, %v514_v50 }
  0x79   :  { %1358 = vmatmul.mubr.msk.f32.gmra.mrb[6].mxu0 %vm120_vm0, %v82_v62 }
  0x7a   :  { %1690 = vmatpush1.bf16.msra.mxu0 %v1689_v63  ;;  %420 = vmatprep.mubr.f32.mxu0 %v2131_v0 }
  0x7b   :  { %1756 = vmatprep.subr.bf16.mxu0 %v2244_v48  ;;  %v325_v48 = vld [vmem:[%s2468_s0 + $0x1a] sm:$0xff]  ;;  %1726 = vmatpush1.bf16.msra.mxu1 %v1725_v16 }
  0x7d   :  { %1359 = vmatmul.mubr.msk.f32.vlgmr.msra.gmra.mrb[0].mxu0 %vm120_vm0, %v323_v9 }
  0x7e   :  { %426 = vmatprep.mubr.f32.mxu0 %v2131_v0  ;;  %1758 = vmatpush1.bf16.msra.mxu0 %v2246_v53  ;;  %v326_v53 = vld [vmem:[%s2468_s0 + $0x22] sm:$0xff] }
  0x7f   :  { %1760 = vmatprep.subr.bf16.mxu0 %v2248_v54  ;;  %v490_v54 = vld [vmem:[#allocation8 + $0x128] sm:$0xff] }
  0x81   :  { %1360 = vmatmul.mubr.msk.f32.gmra.mrb[2].mxu0 %vm120_vm0, %v324_v14 }
  0x82   :  { %432 = vmatprep.mubr.f32.mxu0 %v2131_v0  ;;  %1762 = vmatpush1.bf16.msra.mxu0 %v2257_v2  ;;  %v492_v2 = vld [vmem:[#allocation8 + $0x138] sm:$0xff] }
  0x83   :  { %1764 = vmatprep.subr.bf16.mxu0 %v2260_v4  ;;  %v1727_v4 = vpack.c.bf16 %v492_v2, %v490_v54 }
  0x85   :  { %1361 = vmatmul.mubr.msk.f32.gmra.mrb[4].mxu0 %vm120_vm0, %v325_v48  ;;  %1728 = vmatprep.subr.bf16.mxu1 %v1727_v4 }
  0x86   :  { %438 = vmatprep.mubr.f32.mxu0 %v2131_v0  ;;  %1766 = vmatpush1.bf16.msra.mxu0 %v2268_v15  ;;  %v489_v15 = vld [vmem:[#allocation8 + $0x120] sm:$0xff] }
  0x87   :  { %1768 = vmatprep.subr.bf16.mxu0 %v2271_v17  ;;  %v491_v17 = vld [vmem:[#allocation8 + $0x130] sm:$0xff] }
  0x88   :  { %v1729_v18 = vpack.c.bf16 %v491_v17, %v489_v15 }
  0x89   :  { %1362 = vmatmul.mubr.msk.f32.gmra.mrb[6].mxu0 %vm120_vm0, %v326_v53 }
  0x8a   :  { %1770 = vmatpush1.bf16.msra.mxu0 %v2279_v28  ;;  %1730 = vmatpush1.bf16.msra.mxu1 %v1729_v18  ;;  %v497_v28 = vld [vmem:[#allocation8 + $0x160] sm:$0xff] }
  0x8b   :  { %1772 = vmatprep.subr.bf16.mxu0 %v2282_v30  ;;  %1732 = vmatprep.subr.bf16.mxu1 %v1731_v21  ;;  %v1737_v30 = vpack.c.bf16 %v499_v29, %v497_v28 }
  0x8e   :  { %1774 = vmatpush1.bf16.msra.mxu0 %v2290_v41  ;;  %1734 = vmatpush1.bf16.msra.mxu1 %v1733_v24  ;;  %v507_v41 = vld [vmem:[#allocation8 + $0x1b0] sm:$0xff] }
  0x8f   :  { %1776 = vmatprep.subr.bf16.mxu0 %v2293_v43  ;;  %1736 = vmatprep.subr.bf16.mxu1 %v1735_v27  ;;  %v1745_v42 = vpack.c.bf16 %v507_v41, %v505_v40  ;;  %v510_v43 = vld [vmem:[#allocation8 + $0x1c8] sm:$0xff] }
  0x90   :  { %v1747_v45 = vpack.c.bf16 %v512_v44, %v510_v43 }
  0x92   :  { %1778 = vmatpush1.bf16.msra.mxu0 %v1713_v56  ;;  %1738 = vmatpush1.bf16.msra.mxu1 %v1737_v30  ;;  %v515_v56 = vld [vmem:[#allocation8 + $0x1f0] sm:$0xff] }
  0x93   :  { %1780 = vmatprep.subr.bf16.mxu0 %v1715_v57  ;;  %1740 = vmatprep.subr.bf16.mxu1 %v1739_v33  ;;  %v1753_v57 = vpack.c.bf16 %v515_v56, %v513_v52 }
  0x96   :  { %1782 = vmatpush1.bf16.msra.mxu0 %v1717_v1  ;;  %1742 = vmatpush1.bf16.msra.mxu1 %v1741_v36 }
  0x97   :  { %1784 = vmatprep.subr.bf16.mxu0 %v1719_v3  ;;  %1744 = vmatprep.subr.bf16.mxu1 %v1743_v39 }
  0x9a   :  { %1786 = vmatpush1.bf16.msra.mxu0 %v1721_v10  ;;  %1746 = vmatpush1.bf16.msra.mxu1 %v1745_v42 }
  0x9b   :  { %1788 = vmatprep.subr.bf16.mxu0 %v1723_v11  ;;  %1748 = vmatprep.subr.bf16.mxu1 %v1747_v45 }
  0x9e   :  { %1790 = vmatpush1.bf16.msra.mxu0 %v1725_v16  ;;  %1750 = vmatpush1.bf16.msra.mxu1 %v1749_v49 }
  0x9f   :  { %1792 = vmatprep.subr.bf16.mxu0 %v1727_v4  ;;  %1752 = vmatprep.subr.bf16.mxu1 %v1751_v55 }
  0xa2   :  { %1794 = vmatpush1.bf16.msra.mxu0 %v1729_v18  ;;  %1754 = vmatpush1.bf16.msra.mxu1 %v1753_v57  ;;  %v611_v18 = vlaneseq }
  0xa3   :  { %1796 = vmatprep.subr.bf16.mxu0 %v1731_v21 }
  0xa4   :  { %v2339_v19 = vshrl.u32 %v611_v18, 7 }
  0xa6   :  { %1798 = vmatpush1.bf16.msra.mxu0 %v1733_v24  ;;  %v2342_v20 = vsub.s32 0, %v2339_v19 }
  0xa7   :  { %1800 = vmatprep.subr.bf16.mxu0 %v1735_v27 }
  0xaa   :  { %1802 = vmatpush1.bf16.msra.mxu0 %v1737_v30 }
  0xab   :  { %1804 = vmatprep.subr.bf16.mxu0 %v1739_v33 }
  0xae   :  { %1806 = vmatpush1.bf16.msra.mxu0 %v1741_v36 }
  0xaf   :  { %1808 = vmatprep.subr.bf16.mxu0 %v1743_v39 }
  0xb2   :  { %1810 = vmatpush1.bf16.msra.mxu0 %v1745_v42 }
  0xb3   :  { %1812 = vmatprep.subr.bf16.mxu0 %v1747_v45 }
  0xb6   :  { %1814 = vmatpush1.bf16.msra.mxu0 %v1749_v49 }
  0xb7   :  { %1816 = vmatprep.subr.bf16.mxu0 %v1751_v55 }
  0xba   :  { %1818 = vmatpush1.bf16.msra.mxu0 %v1753_v57 }
 0x150   :  { %v422_v58 = vpop.f32.mrb[0].mxu0 }
 0x151   :  { %v424_v59 = vpop.f32.mrb[1].mxu0 }
 0x154   :  { %v428_v60 = vpop.f32.mrb[2].mxu0 }
 0x155   :  { %v520_v61 = vadd.f32 %v428_v60, %v422_v58  ;;  %v430_v62 = vpop.f32.mrb[3].mxu0 }
 0x156   :  { %v529_v63 = vadd.f32 %v430_v62, %v424_v59 }
 0x158   :  { %v434_v1 = vpop.f32.mrb[4].mxu0 }
 0x159   :  { %v521_v3 = vadd.f32 %v520_v61, %v434_v1  ;;  %v436_v5 = vpop.f32.mrb[5].mxu0 }
 0x15a   :  { %v530_v6 = vadd.f32 %v529_v63, %v436_v5 }
 0x15c   :  { %v440_v7 = vpop.f32.mrb[6].mxu0 }
 0x15d   :  { %v522_v8 = vadd.f32 %v521_v3, %v440_v7  ;;  %v442_v9 = vpop.f32.mrb[7].mxu0  ;;  %v816_v3 = vld [vmem:[#allocation6 + $0x88] sm:$0xff] }
 0x15e   :  { %v531_v10 = vadd.f32 %v530_v6, %v442_v9  ;;  %v817_v6 = vld [vmem:[#allocation6 + $0x90] sm:$0xff] }
 0x15f   :  { %v523_v11 = vrot.slane %v522_v8, 4 }
 0x160   :  { %v532_v12 = vrot.slane %v531_v10, 4 }
 0x161   :  { %v524_v13 = vadd.f32 %v523_v11, %v522_v8 }
 0x162   :  { %v533_v14 = vadd.f32 %v532_v12, %v531_v10  ;;  %v820_v10 = vld [vmem:[#allocation6 + $0xa8] sm:$0xff]  ;;  %v821_v12 = vld [vmem:[#allocation6 + $0xb0] sm:$0xff] }
 0x163   :  { %v525_v16 = vrot.slane %v524_v13, 2 }
 0x164   :  { %v534_v48 = vrot.slane %v533_v14, 2 }
 0x165   :  { %v526_v53 = vadd.f32 %v525_v16, %v524_v13  ;;  %v822_v13 = vld [vmem:[#allocation6 + $0xb8] sm:$0xff]  ;;  %v823_v16 = vld [vmem:[#allocation6 + $0xc0] sm:$0xff] }
 0x166   :  { %v535_v54 = vadd.f32 %v534_v48, %v533_v14  ;;  %v1831_v14 = vpack.c.bf16 %v822_v13, %v821_v12  ;;  %v824_v48 = vld [vmem:[#allocation6 + $0xc8] sm:$0xff] }
 0x167   :  { %v527_v2 = vrot.slane %v526_v53, 1 }
 0x168   :  { %v536_v4 = vrot.slane %v535_v54, 1 }
 0x169   :  { %v528_v17 = vadd.f32 %v527_v2, %v526_v53  ;;  %v1835_v53 = vpack.c.bf16 %v824_v48, %v823_v16  ;;  %v826_v2 = vld [vmem:[#allocation6 + $0xd8] sm:$0xff] }
 0x16a   :  { %v537_v15 = vadd.f32 %v536_v4, %v535_v54  ;;  %v825_v54 = vld [vmem:[#allocation6 + $0xd0] sm:$0xff] }
 0x16b   :  { %v1839_v4 = vpack.c.bf16 %v826_v2, %v825_v54 }
 0x16c   :  { %602 = vmatprep.mubr.f32.mxu1 %v537_v15  ;;  %v827_v15 = vld [vmem:[#allocation6 + $0xe0] sm:$0xff] }
 0x16d   :  { %603 = vmatmul.mubr.f32.vlgmr.msra.gmra.mrb[0].mxu1 %v528_v17  ;;  %v828_v17 = vld [vmem:[#allocation6 + $0xe8] sm:$0xff] }
 0x16e   :  { %v1843_v18 = vpack.c.bf16 %v828_v17, %v827_v15  ;;  %v799_v15 = vld [vmem:[#allocation6 + $0x28] sm:$0xff] }
 0x240   :  { %v604_v21 = vpop.f32.mrb[0].mxu1 }
 0x241   :  { %v609_v22 = vmul.f32 0.001953125, %v604_v21  ;;  %v606_v23 = vpop.f32.mrb[1].mxu1  ;;  %v829_v21 = vld [vmem:[#allocation6 + $0xf0] sm:$0xff] }
 0x242   :  { %v610_v24 = vmul.f32 0.001953125, %v606_v23 }
 0x243   :  { %v614_v25 = vrot.slane %v609_v22, %v2342_v20  ;;  %v830_v22 = vld [vmem:[#allocation6 + $0xf8] sm:$0xff] }
 0x244   :  { %v618_v26 = vrot.slane %v610_v24, %v2342_v20  ;;  %v1847_v23 = vpack.c.bf16 %v830_v22, %v829_v21  ;;  %v794_v24 = vld [vmem:[#allocation6] sm:$0xff]  ;;  %v801_v21 = vld [vmem:[#allocation6 + $0x38] sm:$0xff] }
 0x245   :  { %v2346_v27 = vsub.f32 %v422_v58, %v614_v25  ;;  %v2348_v28 = vsub.f32 %v428_v60, %v614_v25  ;;  %v2350_v29 = vsub.f32 %v434_v1, %v614_v25  ;;  %v2352_v30 = vsub.f32 %v440_v7, %v614_v25  ;;  %v815_v1 = vld [vmem:[#allocation6 + $0x80] sm:$0xff]  ;;  %v818_v7 = vld [vmem:[#allocation6 + $0x98] sm:$0xff]  ;;  %v795_v25 = vld [vmem:[#allocation6 + $0x8] sm:$0xff] }
 0x246   :  { %v2354_v31 = vsub.f32 %v424_v59, %v618_v26  ;;  %v2356_v32 = vsub.f32 %v430_v62, %v618_v26  ;;  %v2358_v33 = vsub.f32 %v436_v5, %v618_v26  ;;  %v2360_v34 = vsub.f32 %v442_v9, %v618_v26  ;;  %v819_v9 = vld [vmem:[#allocation6 + $0xa0] sm:$0xff] }
 0x247   :  { %v627_v35 = vmul.f32 %v2346_v27, %v2346_v27  ;;  %v629_v36 = vmul.f32 %v2348_v28, %v2348_v28  ;;  %v631_v39 = vmul.f32 %v2350_v29, %v2350_v29  ;;  %v633_v43 = vmul.f32 %v2352_v30, %v2352_v30 }
 0x248   :  { %v628_v37 = vmul.f32 %v2354_v31, %v2354_v31  ;;  %v630_v38 = vmul.f32 %v2356_v32, %v2356_v32  ;;  %v632_v41 = vmul.f32 %v2358_v33, %v2358_v33  ;;  %v634_v45 = vmul.f32 %v2360_v34, %v2360_v34 }
 0x249   :  { %v635_v40 = vadd.f32 %v629_v36, %v627_v35  ;;  %v1819_v5 = vpack.c.bf16 %v816_v3, %v815_v1  ;;  %v1823_v8 = vpack.c.bf16 %v818_v7, %v817_v6  ;;  %v1827_v11 = vpack.c.bf16 %v820_v10, %v819_v9  ;;  %v1111_v35 = vld [vmem:[#allocation9] sm:$0xff]  ;;  %v1112_v36 = vld [vmem:[#allocation9 + $0x8] sm:$0xff] }
 0x24a   :  { %v644_v42 = vadd.f32 %v630_v38, %v628_v37  ;;  %v2378_v26 = vpack.c.bf16 %v795_v25, %v794_v24  ;;  %v1113_v37 = vld [vmem:[#allocation9 + $0x10] sm:$0xff]  ;;  %v2132_v38 = vmov 0.0|0.0   ;;  %v802_v24 = vld [vmem:[#allocation6 + $0x40] sm:$0xff]  ;;  %v803_v25 = vld [vmem:[#allocation6 + $0x48] sm:$0xff] }
 0x24b   :  { %v636_v44 = vadd.f32 %v635_v40, %v631_v39  ;;  %1820 = vmatprep.subr.bf16.mxu1 %v1819_v5  ;;  %1915 = vmatprep.subr.bf16.mxu0 %v2132_v38  ;;  %v2382_v39 = vpack.c.bf16 %v1112_v36, %v1111_v35  ;;  %v1114_v40 = vld [vmem:[#allocation9 + $0x18] sm:$0xff]  ;;  %v1867_v35 = vpack.c.bf16 %v803_v25, %v802_v24  ;;  %v804_v36 = vld [vmem:[#allocation6 + $0x50] sm:$0xff] }
 0x24c   :  { %v645_v46 = vadd.f32 %v644_v42, %v632_v41  ;;  %1822 = vmatpush3.bf16.msra.mxu1 %v1819_v5  ;;  %v2385_v41 = vpack.c.bf16 %v1114_v40, %v1113_v37  ;;  %v1115_v42 = vld [vmem:[#allocation9 + $0x20] sm:$0xff]  ;;  %v805_v37 = vld [vmem:[#allocation6 + $0x58] sm:$0xff]  ;;  %v1125_v25 = vld [vmem:[#allocation9 + $0x70] sm:$0xff] }
 0x24d   :  { %v637_v47 = vadd.f32 %v636_v44, %v633_v43  ;;  %1824 = vmatprep.subr.bf16.mxu1 %v1823_v8  ;;  %v1116_v43 = vld [vmem:[#allocation9 + $0x28] sm:$0xff]  ;;  %v806_v40 = vld [vmem:[#allocation6 + $0x60] sm:$0xff] }
 0x24e   :  { %v646_v49 = vadd.f32 %v645_v46, %v634_v45  ;;  %v2389_v44 = vpack.c.bf16 %v1116_v43, %v1115_v42  ;;  %v807_v42 = vld [vmem:[#allocation6 + $0x68] sm:$0xff] }
 0x24f   :  { %v638_v50 = vrot.slane %v637_v47, 4  ;;  %v1875_v43 = vpack.c.bf16 %v807_v42, %v806_v40 }
 0x250   :  { %v647_v51 = vrot.slane %v646_v49, 4  ;;  %1826 = vmatpush3.bf16.msra.mxu1 %v1823_v8 }
 0x251   :  { %v639_v52 = vadd.f32 %v638_v50, %v637_v47  ;;  %1828 = vmatprep.subr.bf16.mxu1 %v1827_v11 }
 0x252   :  { %v648_v55 = vadd.f32 %v647_v51, %v646_v49 }
 0x253   :  { %v640_v56 = vrot.slane %v639_v52, 2 }
 0x254   :  { %v649_v57 = vrot.slane %v648_v55, 2  ;;  %1830 = vmatpush3.bf16.msra.mxu1 %v1827_v11 }
 0x255   :  { %v641_v58 = vadd.f32 %v640_v56, %v639_v52  ;;  %1832 = vmatprep.subr.bf16.mxu1 %v1831_v14  ;;  %v517_v52 = vld [vmem:[%s2473_s5] ss:$2 sm:$0x3] }
 0x256   :  { %v650_v59 = vadd.f32 %v649_v57, %v648_v55  ;;  %v737_v55 = vsub.s32 1, %v2339_v19  ;;  %v734_v56 = vrot.slane %v517_v52, %v2342_v20 }
 0x257   :  { %v642_v60 = vrot.slane %v641_v58, 1 }
 0x258   :  { %v651_v61 = vrot.slane %v650_v59, 1  ;;  %1834 = vmatpush3.bf16.msra.mxu1 %v1831_v14  ;;  %v738_v57 = vrot.slane %v517_v52, %v737_v55  ;;  %v1008_v52 = vld [vmem:[#allocation6 + $0x110] sm:$0xff] }
 0x259   :  { %v643_v63 = vadd.f32 %v642_v60, %v641_v58  ;;  %1836 = vmatprep.subr.bf16.mxu1 %v1835_v53 }
 0x25a   :  { %v652_v62 = vadd.f32 %v651_v61, %v650_v59  ;;  %v1363_v59 = vld [vmem:[%s2473_s5 + $0x1] ss:$2 sm:$0x3] }
 0x25b   :  { %v763_v1 = vrot.slane %v1363_v59, %v2342_v20  ;;  %v767_v5 = vrot.slane %v1363_v59, %v737_v55  ;;  %v1009_v55 = vld [vmem:[#allocation6 + $0x118] sm:$0xff]  ;;  %v1011_v59 = vld [vmem:[#allocation6 + $0x128] sm:$0xff] }
 0x25c   :  { %717 = vmatprep.mubr.f32.mxu0 %v652_v62  ;;  %1838 = vmatpush3.bf16.msra.mxu1 %v1835_v53  ;;  %v796_v53 = vld [vmem:[#allocation6 + $0x10] sm:$0xff] }
 0x25d   :  { %718 = vmatmul.mubr.f32.vlgmr.msra.gmra.mrb[8].mxu0 %v643_v63  ;;  %1840 = vmatprep.subr.bf16.mxu1 %v1839_v4 }
 0x25e   :  { %1917 = vmatpush3.bf16.msra.mxu0 %v2382_v39  ;;  %1605 = vmatprep.mubr.msk.f32.mxu0 %vm2133_vm1, %v2131_v0 }
 0x25f   :  { %1918 = vmatprep.subr.bf16.mxu0 %v2132_v38 }
 0x260   :  { %1842 = vmatpush3.bf16.msra.mxu1 %v1839_v4 }
 0x261   :  { %1844 = vmatprep.subr.bf16.mxu1 %v1843_v18 }
 0x262   :  { %1920 = vmatpush3.bf16.msra.mxu0 %v2385_v41 }
 0x263   :  { %1921 = vmatprep.subr.bf16.mxu0 %v2132_v38 }
 0x264   :  { %1846 = vmatpush3.bf16.msra.mxu1 %v1843_v18  ;;  %v800_v18 = vld [vmem:[#allocation6 + $0x30] sm:$0xff] }
 0x265   :  { %1848 = vmatprep.subr.bf16.mxu1 %v1847_v23 }
 0x266   :  { %1923 = vmatpush3.bf16.msra.mxu0 %v2389_v44 }
 0x267   :  { %1924 = vmatprep.subr.bf16.mxu0 %v2132_v38 }
 0x268   :  { %1850 = vmatpush3.bf16.msra.mxu1 %v1847_v23  ;;  %v1863_v23 = vpack.c.bf16 %v801_v21, %v800_v18  ;;  %v1122_v18 = vld [vmem:[#allocation9 + $0x58] sm:$0xff] }
 0x269   :  { %1852 = vmatprep.subr.bf16.mxu1 %v2378_v26 }
 0x330   :  { %v719_v45 = vpop.f32.mrb[8].mxu0 }
 0x331   :  { %v724_v46 = vmul.f32 0.001953125, %v719_v45  ;;  %v721_v47 = vpop.f32.mrb[9].mxu0  ;;  %v808_v45 = vld [vmem:[#allocation6 + $0x70] sm:$0xff] }
 0x332   :  { %v725_v49 = vmul.f32 0.001953125, %v721_v47 }
 0x333   :  { %v726_v50 = vadd.f32 1e-05, %v724_v46  ;;  %v809_v46 = vld [vmem:[#allocation6 + $0x78] sm:$0xff] }
 0x334   :  { %v727_v51 = vadd.f32 1e-05, %v725_v49  ;;  %v1879_v47 = vpack.c.bf16 %v809_v46, %v808_v45  ;;  %v1006_v49 = vld [vmem:[#allocation6 + $0x100] sm:$0xff] }
 0x335   :  { %1999 = vrsqrt.f32 %v726_v50  ;;  %v1007_v50 = vld [vmem:[#allocation6 + $0x108] sm:$0xff] }
 0x336   :  { %2001 = vrsqrt.f32 %v727_v51  ;;  %v1883_v51 = vpack.c.bf16 %v1007_v50, %v1006_v49 }
 0x33f   :  { %v2000_v58 = vpop.eup %1999 }
 0x340   :  { %v2002_v60 = vpop.eup %2001  ;;  %v741_v61 = vmul.f32 %v2000_v58, %v734_v56  ;;  %v1887_v56 = vpack.c.bf16 %v1009_v55, %v1008_v52  ;;  %v1010_v58 = vld [vmem:[#allocation6 + $0x120] sm:$0xff] }
 0x341   :  { %v742_v62 = vmul.f32 %v2002_v60, %v738_v57 }
 0x342   :  { %v746_v63 = vrot.slane %v741_v61, %v2342_v20  ;;  %v1891_v61 = vpack.c.bf16 %v1011_v59, %v1010_v58 }
 0x343   :  { %v750_v3 = vrot.slane %v742_v62, %v2342_v20 }
 0x344   :  { %v751_v19 = vmul.f32 %v746_v63, %v2346_v27  ;;  %v753_v6 = vmul.f32 %v746_v63, %v2348_v28  ;;  %v755_v7 = vmul.f32 %v746_v63, %v2350_v29  ;;  %v757_v8 = vmul.f32 %v746_v63, %v2352_v30  ;;  %v797_v27 = vld [vmem:[#allocation6 + $0x18] sm:$0xff]  ;;  %v1012_v63 = vld [vmem:[#allocation6 + $0x130] sm:$0xff] }
 0x345   :  { %v752_v9 = vmul.f32 %v750_v3, %v2354_v31  ;;  %v754_v10 = vmul.f32 %v750_v3, %v2356_v32  ;;  %v756_v11 = vmul.f32 %v750_v3, %v2358_v33  ;;  %v758_v12 = vmul.f32 %v750_v3, %v2360_v34  ;;  %v798_v34 = vld [vmem:[#allocation6 + $0x20] sm:$0xff] }
 0x346   :  { %v770_v13 = vadd.f32 %v763_v1, %v751_v19  ;;  %v772_v14 = vadd.f32 %v763_v1, %v753_v6  ;;  %v774_v16 = vadd.f32 %v763_v1, %v755_v7  ;;  %v776_v48 = vadd.f32 %v763_v1, %v757_v8  ;;  %v1013_v1 = vld [vmem:[#allocation6 + $0x138] sm:$0xff]  ;;  %v1014_v19 = vld [vmem:[#allocation6 + $0x140] sm:$0xff]  ;;  %v1015_v6 = vld [vmem:[#allocation6 + $0x148] sm:$0xff] }
 0x347   :  { %v2413_v54 = vadd.f32 %v767_v5, %v752_v9  ;;  %v2415_v28 = vadd.f32 %v767_v5, %v754_v10  ;;  %v2417_v29 = vadd.f32 %v767_v5, %v756_v11  ;;  %v2419_v30 = vadd.f32 %v767_v5, %v758_v12  ;;  %v1016_v8 = vld [vmem:[#allocation6 + $0x150] sm:$0xff]  ;;  %v1017_v9 = vld [vmem:[#allocation6 + $0x158] sm:$0xff]  ;;  %v1018_v11 = vld [vmem:[#allocation6 + $0x160] sm:$0xff] }
 0x348   :  { %v778_v31 = vmax.f32 %v770_v13, 0.0  ;;  %v779_v32 = vmax.f32 %v772_v14, 0.0  ;;  %v780_v2 = vmax.f32 %v774_v16, 0.0  ;;  %v781_v33 = vmax.f32 %v776_v48, 0.0  ;;  %v1019_v12 = vld [vmem:[#allocation6 + $0x168] sm:$0xff]  ;;  %v1020_v14 = vld [vmem:[#allocation6 + $0x170] sm:$0xff] }
 0x349   :  { %v1855_v4 = vpack.c.bf16 %v797_v27, %v796_v53  ;;  %v1859_v17 = vpack.c.bf16 %v799_v15, %v798_v34  ;;  %v1895_v5 = vpack.c.bf16 %v1013_v1, %v1012_v63  ;;  %v1899_v7 = vpack.c.bf16 %v1015_v6, %v1014_v19  ;;  %v1021_v16 = vld [vmem:[#allocation6 + $0x178] sm:$0xff]  ;;  %v1120_v34 = vld [vmem:[#allocation9 + $0x48] sm:$0xff] }
 0x34a   :  { %786 = vst [vmem:[#allocation2 + $0x1] sm:$0xff] %v778_v31  ;;  %787 = vst [vmem:[#allocation2 + $0x9] sm:$0xff] %v779_v32  ;;  %1491 = vmatprep.mubr.f32.mxu1 %v778_v31  ;;  %v1903_v10 = vpack.c.bf16 %v1017_v9, %v1016_v8  ;;  %v1907_v13 = vpack.c.bf16 %v1019_v12, %v1018_v11  ;;  %v1911_v48 = vpack.c.bf16 %v1021_v16, %v1020_v14  ;;  %v1127_v14 = vld [vmem:[%s2473_s5 + $0x4] sm:$0x1] }
 0x34b   :  { %788 = vst [vmem:[#allocation2 + $0x19] sm:$0xff] %v780_v2  ;;  %789 = vst [vmem:[#allocation2 + $0x21] sm:$0xff] %v781_v33  ;;  %1492 = vmatmul.mubr.f32.vlgmr.msra.gmra.mrb[2].mxu1 %v779_v32  ;;  %v1117_v32 = vld [vmem:[#allocation9 + $0x30] sm:$0xff] }
 0x34c   :  { %1854 = vmatpush3.bf16.msra.mxu1 %v2378_v26  ;;  %1494 = vmatprep.mubr.f32.mxu1 %v780_v2  ;;  %v1871_v26 = vpack.c.bf16 %v805_v37, %v804_v36  ;;  %v1118_v2 = vld [vmem:[#allocation9 + $0x38] sm:$0xff] }
 0x34d   :  { %1856 = vmatprep.subr.bf16.mxu1 %v1855_v4 }
 0x34f   :  { %1495 = vmatmul.mubr.f32.gmra.mrb[4].mxu1 %v781_v33  ;;  %v1925_v33 = vpack.c.bf16 %v1118_v2, %v1117_v32 }
 0x350   :  { %1858 = vmatpush3.bf16.msra.mxu1 %v1855_v4  ;;  %v1119_v4 = vld [vmem:[#allocation9 + $0x40] sm:$0xff] }
 0x351   :  { %v790_v22 = vld [vmem:[#allocation2] sm:$0xff]  ;;  %1860 = vmatprep.subr.bf16.mxu1 %v1859_v17  ;;  %v791_v57 = vld [vmem:[#allocation2 + $0x8] sm:$0xff]  ;;  %1926 = vmatpush3.bf16.msra.mxu0 %v1925_v33  ;;  %v1928_v15 = vpack.c.bf16 %v1120_v34, %v1119_v4 }
 0x352   :  { %1529 = vmatprep.mubr.f32.mxu1 %v790_v22  ;;  %v792_v60 = vld [vmem:[#allocation2 + $0x18] sm:$0xff]  ;;  %v793_v62 = vld [vmem:[#allocation2 + $0x20] sm:$0xff]  ;;  %v1002_v53 = vld [vmem:[#allocation2 + $0xa] sm:$0xff]  ;;  %1927 = vmatprep.subr.bf16.mxu0 %v2132_v38 }
 0x353   :  { %v1001_v3 = vld [vmem:[#allocation2 + $0x2] sm:$0xff]  ;;  %v1003_v27 = vld [vmem:[#allocation2 + $0x1a] sm:$0xff]  ;;  %v1123_v22 = vld [vmem:[#allocation9 + $0x60] sm:$0xff] }
 0x354   :  { %1862 = vmatpush3.bf16.msra.mxu1 %v1859_v17  ;;  %v1004_v31 = vld [vmem:[#allocation2 + $0x22] sm:$0xff] }
 0x355   :  { %1864 = vmatprep.subr.bf16.mxu1 %v1863_v23  ;;  %1929 = vmatpush3.bf16.msra.mxu0 %v1928_v15  ;;  %v1121_v17 = vld [vmem:[#allocation9 + $0x50] sm:$0xff] }
 0x356   :  { %1930 = vmatprep.subr.bf16.mxu0 %v2132_v38  ;;  %v1931_v21 = vpack.c.bf16 %v1122_v18, %v1121_v17 }
 0x358   :  { %1866 = vmatpush3.bf16.msra.mxu1 %v1863_v23  ;;  %v1124_v23 = vld [vmem:[#allocation9 + $0x68] sm:$0xff] }
 0x359   :  { %1868 = vmatprep.subr.bf16.mxu1 %v1867_v35  ;;  %1932 = vmatpush3.bf16.msra.mxu0 %v1931_v21  ;;  %v1934_v24 = vpack.c.bf16 %v1124_v23, %v1123_v22 }
 0x35a   :  { %1933 = vmatprep.subr.bf16.mxu0 %v2132_v38 }
 0x35c   :  { %1870 = vmatpush3.bf16.msra.mxu1 %v1867_v35  ;;  %v1126_v35 = vld [vmem:[#allocation9 + $0x78] sm:$0xff] }
 0x35d   :  { %1872 = vmatprep.subr.bf16.mxu1 %v1871_v26  ;;  %1935 = vmatpush3.bf16.msra.mxu0 %v1934_v24  ;;  %v1937_v36 = vpack.c.bf16 %v1126_v35, %v1125_v25 }
 0x35e   :  { %1936 = vmatprep.subr.bf16.mxu0 %v2132_v38 }
 0x360   :  { %1874 = vmatpush3.bf16.msra.mxu1 %v1871_v26 }
 0x361   :  { %1876 = vmatprep.subr.bf16.mxu1 %v1875_v43  ;;  %1938 = vmatpush3.bf16.msra.mxu0 %v1937_v36 }
 0x362   :  { %1939 = vmatprep.subr.bf16.mxu0 %v2132_v38 }
 0x364   :  { %1878 = vmatpush3.bf16.msra.mxu1 %v1875_v43 }
 0x365   :  { %1880 = vmatprep.subr.bf16.mxu1 %v1879_v47 }
 0x368   :  { %1882 = vmatpush3.bf16.msra.mxu1 %v1879_v47 }
 0x369   :  { %1884 = vmatprep.subr.bf16.mxu1 %v1883_v51 }
 0x36b   :  { %1530 = vmatmul.mubr.f32.vlgmr.msra.gmra.mrb[2].mxu1 %v791_v57 }
 0x36c   :  { %1532 = vmatprep.mubr.f32.mxu1 %v792_v60  ;;  %1886 = vmatpush3.bf16.msra.mxu1 %v1883_v51 }
 0x36d   :  { %1888 = vmatprep.subr.bf16.mxu1 %v1887_v56 }
 0x36f   :  { %1533 = vmatmul.mubr.f32.gmra.mrb[4].mxu1 %v793_v62 }
 0x370   :  { %1890 = vmatpush3.bf16.msra.mxu1 %v1887_v56  ;;  %1567 = vmatprep.mubr.f32.mxu1 %v1001_v3 }
 0x371   :  { %1892 = vmatprep.subr.bf16.mxu1 %v1891_v61 }
 0x374   :  { %1894 = vmatpush3.bf16.msra.mxu1 %v1891_v61 }
 0x375   :  { %1896 = vmatprep.subr.bf16.mxu1 %v1895_v5 }
 0x378   :  { %1898 = vmatpush3.bf16.msra.mxu1 %v1895_v5 }
 0x379   :  { %1900 = vmatprep.subr.bf16.mxu1 %v1899_v7 }
 0x37c   :  { %1902 = vmatpush3.bf16.msra.mxu1 %v1899_v7 }
 0x37d   :  { %1904 = vmatprep.subr.bf16.mxu1 %v1903_v10 }
 0x380   :  { %1906 = vmatpush3.bf16.msra.mxu1 %v1903_v10 }
 0x381   :  { %1908 = vmatprep.subr.bf16.mxu1 %v1907_v13 }
 0x384   :  { %1910 = vmatpush3.bf16.msra.mxu1 %v1907_v13 }
 0x385   :  { %1912 = vmatprep.subr.bf16.mxu1 %v1911_v48 }
 0x388   :  { %1914 = vmatpush3.bf16.msra.mxu1 %v1911_v48 }
 0x38b   :  { %1568 = vmatmul.mubr.f32.vlgmr.msra.gmra.mrb[2].mxu1 %v1002_v53 }
 0x38c   :  { %1570 = vmatprep.mubr.f32.mxu1 %v1003_v27  ;;  %v1364_v27 = vld [vmem:[%s2473_s5 + $0x5] ss:$0 sm:$0xff]  ;;  %s2093_s5 = scalar_lea.vmem %s1338_s28, 512 }
 0x38d   :  { %p2094_p4 = scmp.ne.s32.totalorder %s1338_s28, %s2093_s5  ;;  %p2099_p6 = scmp.lt.s32.totalorder %s2093_s5, %s2093_s5 }
 0x38f   :  { %1571 = vmatmul.mubr.f32.gmra.mrb[4].mxu1 %v1004_v31  ;;  %p2100_p7 = por %p2099_p6, %p2098_p5 }
 0x391   :  { %p2101_p8 = pnand %p2100_p7, %p2094_p4 }
 0x45e   :  { %v1569_v37 = vpop.f32.mrb[2].mxu1 }
 0x45f   :  { %v1088_v26 = vpop.f32.mrb[3].mxu1 }
 0x460   :  { %v1129_v40 = vadd.f32 %v1569_v37, %v1088_v26 }
 0x462   :  { %v1572_v42 = vpop.f32.mrb[4].mxu1 }
 0x463   :  { %v1098_v43 = vpop.f32.mrb[5].mxu1 }
 0x464   :  { %v1130_v45 = vadd.f32 %v1129_v40, %v1098_v43 }
 0x466   :  { %v1131_v46 = vadd.f32 %v1572_v42, %v1130_v45 }
 0x468   :  { %v1132_v47 = vrot.slane %v1131_v46, 4 }
 0x46a   :  { %v1133_v49 = vadd.f32 %v1132_v47, %v1131_v46 }
 0x46c   :  { %v1134_v50 = vrot.slane %v1133_v49, 2 }
 0x46e   :  { %v1135_v51 = vadd.f32 %v1134_v50, %v1133_v49 }
 0x470   :  { %v1136_v52 = vrot.slane %v1135_v51, 1 }
 0x472   :  { %v1137_v55 = vadd.f32 %v1136_v52, %v1135_v51 }
 0x474   :  { %1606 = vmatmul.mubr.f32.vlgmr.msra.gmra.mrb[10].mxu0 %v1137_v55 }
 0x475   :  { %1941 = vmatpush3.bf16.msra.mxu0 %v2382_v39  ;;  %1640 = vmatprep.mubr.msk.f32.mxu0 %vm2133_vm1, %v2131_v0 }
 0x476   :  { %1942 = vmatprep.subr.bf16.mxu0 %v2132_v38 }
 0x479   :  { %1944 = vmatpush3.bf16.msra.mxu0 %v2385_v41 }
 0x47a   :  { %1945 = vmatprep.subr.bf16.mxu0 %v2132_v38 }
 0x47d   :  { %1947 = vmatpush3.bf16.msra.mxu0 %v2389_v44 }
 0x47e   :  { %1948 = vmatprep.subr.bf16.mxu0 %v2132_v38 }
 0x481   :  { %1950 = vmatpush3.bf16.msra.mxu0 %v1925_v33 }
 0x482   :  { %1951 = vmatprep.subr.bf16.mxu0 %v2132_v38 }
 0x485   :  { %1953 = vmatpush3.bf16.msra.mxu0 %v1928_v15 }
 0x486   :  { %1954 = vmatprep.subr.bf16.mxu0 %v2132_v38 }
 0x489   :  { %1956 = vmatpush3.bf16.msra.mxu0 %v1931_v21 }
 0x48a   :  { %1957 = vmatprep.subr.bf16.mxu0 %v2132_v38 }
 0x48d   :  { %1959 = vmatpush3.bf16.msra.mxu0 %v1934_v24 }
 0x48e   :  { %1960 = vmatprep.subr.bf16.mxu0 %v2132_v38 }
 0x491   :  { %1962 = vmatpush3.bf16.msra.mxu0 %v1937_v36 }
 0x547   :  { %v1204_v0 = vpop.f32.mrb[10].mxu0 }
 0x548   :  { %v1208_v39 = vmul.f32 0.001953125, %v1204_v0  ;;  %v1607_v41 = vpop.f32.mrb[11].mxu0 }
 0x54a   :  { %v1212_v44 = vrot.slane %v1208_v39, %v2342_v20 }
 0x54c   :  { %v1213_v56 = vsub.f32 %v1088_v26, %v1212_v44  ;;  %v1214_v57 = vsub.f32 %v1569_v37, %v1212_v44  ;;  %v1215_v58 = vsub.f32 %v1098_v43, %v1212_v44  ;;  %v1216_v59 = vsub.f32 %v1572_v42, %v1212_v44 }
 0x54e   :  { %v1217_v60 = vmul.f32 %v1213_v56, %v1213_v56  ;;  %v1218_v61 = vmul.f32 %v1214_v57, %v1214_v57  ;;  %v1219_v62 = vmul.f32 %v1215_v58, %v1215_v58  ;;  %v1220_v1 = vmul.f32 %v1216_v59, %v1216_v59 }
 0x550   :  { %v1221_v63 = vadd.f32 %v1218_v61, %v1217_v60 }
 0x552   :  { %v1222_v3 = vadd.f32 %v1221_v63, %v1219_v62 }
 0x554   :  { %v1223_v5 = vadd.f32 %v1222_v3, %v1220_v1 }
 0x556   :  { %v1224_v19 = vrot.slane %v1223_v5, 4 }
 0x558   :  { %v1225_v6 = vadd.f32 %v1224_v19, %v1223_v5 }
 0x55a   :  { %v1226_v38 = vrot.slane %v1225_v6, 2 }
 0x55c   :  { %v1227_v7 = vadd.f32 %v1226_v38, %v1225_v6 }
 0x55e   :  { %v1228_v8 = vrot.slane %v1227_v7, 1 }
 0x560   :  { %v1229_v9 = vadd.f32 %v1228_v8, %v1227_v7 }
 0x562   :  { %1641 = vmatmul.mubr.f32.vlgmr.msra.gmra.mrb[12].mxu0 %v1229_v9 }
 0x635   :  { %v1296_v10 = vpop.f32.mrb[12].mxu0 }
 0x636   :  { %v1300_v11 = vmul.f32 0.001953125, %v1296_v10  ;;  %v1642_v12 = vpop.f32.mrb[13].mxu0 }
 0x638   :  { %v1301_v13 = vadd.f32 1e-05, %v1300_v11 }
 0x63a   :  { %2003 = vrsqrt.f32 %v1301_v13 }
 0x644   :  { %v2004_v16 = vpop.eup %2003 }
 0x645   :  { %v1303_v48 = vmul.f32 %v2004_v16, %v1127_v14 }
 0x647   :  { %v1307_v53 = vrot.slane %v1303_v48, %v2342_v20 }
 0x649   :  { %v1308_v31 = vmul.f32 %v1307_v53, %v1213_v56  ;;  %v1309_v32 = vmul.f32 %v1307_v53, %v1214_v57  ;;  %v1310_v2 = vmul.f32 %v1307_v53, %v1215_v58  ;;  %v1311_v33 = vmul.f32 %v1307_v53, %v1216_v59 }
 0x64b   :  { %v1316_v4 = vadd.f32 %v1364_v27, %v1308_v31  ;;  %v1317_v34 = vadd.f32 %v1364_v27, %v1309_v32  ;;  %v1318_v15 = vadd.f32 %v1364_v27, %v1310_v2  ;;  %v1319_v17 = vadd.f32 %v1364_v27, %v1311_v33 }
 0x64d   :  { %v1320_v18 = vadd.f32 %v1316_v4, %v2413_v54  ;;  %v1321_v21 = vadd.f32 %v1317_v34, %v2415_v28  ;;  %v1322_v20 = vadd.f32 %v1318_v15, %v2417_v29  ;;  %v1323_v22 = vadd.f32 %v1319_v17, %v2419_v30 }
 0x64f   :  { %v1324_v23 = vmax.f32 %v1320_v18, 0.0  ;;  %v1325_v24 = vmax.f32 %v1321_v21, 0.0  ;;  %v1326_v25 = vmax.f32 %v1322_v20, 0.0  ;;  %v1327_v35 = vmax.f32 %v1323_v22, 0.0 }
 0x651   :  { %1328 = vst [vmem:[#allocation11] sm:$0xff] %v1324_v23  ;;  %1329 = vst [vmem:[#allocation11 + $0x8] sm:$0xff] %v1325_v24 }
 0x652   :  { %1330 = vst [vmem:[#allocation11 + $0x10] sm:$0xff] %v1326_v25  ;;  %1331 = vst [vmem:[#allocation11 + $0x18] sm:$0xff] %v1327_v35 }
 0x653   :  { %2104 = shalt.err (!%p2101_p8)
}
 0x654   :  { %s2105_s9 = scalar_lea.hbm %s2474_s6, 512 }
 0x655   :  { %p2106_p9 = scmp.ne.s32.totalorder %s2474_s6, %s2105_s9  ;;  %p2109_p10 = scmp.lt.u32.totalorder %s2105_s9, %s2474_s6 }
 0x657   :  { %p2111_p11 = pnand %p2109_p10, %p2106_p9 }
 0x659   :  { %2114 = shalt.err (!%p2111_p11)
}
 0x65a   :  { %1343 = dma.vmem_to_hbm [thread:$0]  %s1338_s28, 512, %s2474_s6, [#allocation5], %s2124_s7, %s2124_s7, %s2125_s8  }
 0x65b   :  { %2121 = dma.done.wait [#allocation5], 512  }
 0x65c   :  { %2122 = vsyncadd [#allocation5], 4294966784 }
 0x65d   :  { %1347 = vsyncpa [#allocation4], 1 }
 0x65e   :  { %1348 = vsyncpa [#allocation7], 1 }
 0x65f   :  { %1349 = vsyncpa [#allocation10], 1 }
 0x660   :  { %1350 = vsyncpa [#allocation5], 1 }

</bundles_post_ra>
